<compile_context>
chip_gen: v7x
topology: tpu7x:2x2x1
jax: 0.10.0
libtpu: 0.0.40
codegen_flags: <defaults>
</compile_context>

<pallas_src>
import functools

import jax
import jax.numpy as jnp
from jax.experimental import pallas as pl
from jax.experimental.pallas import tpu as pltpu


def _highway_kernel(x_ref, a1_ref, b1_ref, a2_ref, b2_ref, out_ref,
                    xbuf_ref, midbuf_ref, *, width):
    # x_ref   : (1, Cin, H*W)       flattened NCHW input (channel-major, lane-dense)
    # a1_ref  : (2*Cmid, 25*Cin)    [w5 ; w3 zero-embedded in the 5x5 tap grid]
    # b1_ref  : (2*Cmid, 1)         [b5 ; b3]
    # a2_ref  : (Cout, 9*2*Cmid)    concat-conv weight, im2col layout
    # b2_ref  : (Cout, 1)
    # out_ref : (1, Cout, H*W)
    # xbuf_ref   : VMEM (Cin,    H*W + 4*W + 4)   row-flat x with 2 zero pad rows
    # midbuf_ref : VMEM (2*Cmid, H*W + 2*W + 2)   row-flat mid with 1 zero pad row
    W = width
    HW = x_ref.shape[2]
    f32 = jnp.float32

    # Column index of every flattened spatial position (lane axis). Used to mask
    # horizontal taps that would otherwise wrap across image rows.
    col = jax.lax.broadcasted_iota(jnp.int32, (1, HW), 1) % W

    def shifted_taps(buf, ksize, pad):
        """im2col rows of a ksize x ksize conv over a row-flat padded buffer.

        The buffer has `pad` zero rows on top/bottom and a lead offset of `pad`
        lanes, so tap (kh, kw) is simply the slice starting at kh*W + kw.
        """
        rows = []
        for kh in range(ksize):
            for kw in range(ksize):
                s = kh * W + kw
                sl = buf[:, s:s + HW]
                dx = kw - pad
                if dx != 0:
                    valid = jnp.logical_and(col + dx >= 0, col + dx < W)
                    sl = jnp.where(valid, sl, 0.0)
                rows.append(sl)
        return jnp.concatenate(rows, axis=0)          # (ksize*ksize*C, HW)

    # ---- stage 0: place x into the row-flat buffer (in-kernel zero padding) ----
    # Scratches are tiny and lane-dense; zero per step so the kernel stays correct
    # under megacore ("parallel") grid sharding.
    xbuf_ref[...] = jnp.zeros_like(xbuf_ref)
    xbuf_ref[:, 2 * W + 2: 2 * W + 2 + HW] = x_ref[0]

    # ---- stage 1: conv5x5(x) and conv3x3(x) fused into ONE im2col matmul ------
    im1 = shifted_taps(xbuf_ref[...], 5, 2)                         # (25*Cin, HW)
    mid = jnp.dot(a1_ref[...], im1, preferred_element_type=f32) + b1_ref[...]
    # mid: (2*Cmid, HW) == channel-concat [conv5x5 ; conv3x3] (no lane concat).

    # ---- stage 2: 3x3 concat-conv (padding=1) over mid, same trick ------------
    midbuf_ref[...] = jnp.zeros_like(midbuf_ref)
    midbuf_ref[:, W + 1: W + 1 + HW] = mid
    im2 = shifted_taps(midbuf_ref[...], 3, 1)                       # (9*2*Cmid, HW)
    out = jnp.dot(a2_ref[...], im2, preferred_element_type=f32) + b2_ref[...]

    out_ref[0] = jnp.tanh(out)


def highway_output_2d(x_nchw, params):
    """Fused HighwayOutput2D forward. x_nchw: (B, Cin, H, W) float32 (NCHW)."""
    w5, b5, w3, b3, wc, bc = params
    B, Cin, H, W = x_nchw.shape
    Cmid = w5.shape[-1]
    Cout = wc.shape[-1]
    HW = H * W
    f32 = jnp.float32

    # --- weight preprocessing (tiny, one-time) --------------------------------
    # im2col row ordering is ((kh*K + kw)*C + c); stack the 3x3 weight (zero-
    # embedded into the 5x5 tap grid) below the 5x5 weight along out-channels so
    # a single matmul produces the channel-concat [conv5x5 ; conv3x3].
    a5 = jnp.transpose(w5, (3, 0, 1, 2)).reshape(Cmid, 25 * Cin)
    w3e = jnp.zeros((5, 5, Cin, Cmid), w3.dtype).at[1:4, 1:4, :, :].set(w3)
    a3 = jnp.transpose(w3e, (3, 0, 1, 2)).reshape(Cmid, 25 * Cin)
    a1 = jnp.concatenate([a5, a3], axis=0).astype(f32)              # (2*Cmid, 25*Cin)
    b1 = jnp.concatenate([b5, b3], axis=0).reshape(2 * Cmid, 1).astype(f32)
    a2 = jnp.transpose(wc, (3, 0, 1, 2)).reshape(Cout, 9 * 2 * Cmid).astype(f32)
    b2 = bc.reshape(Cout, 1).astype(f32)

    # NCHW -> (B, C, H*W): a free reshape, no transpose / pad in the wrapper.
    x_flat = x_nchw.reshape(B, Cin, HW).astype(f32)

    fb = HW + 4 * W + 4        # row-flat x buffer (pad=2)
    mb = HW + 2 * W + 2        # row-flat mid buffer (pad=1)

    kernel = functools.partial(_highway_kernel, width=W)

    out_flat = pl.pallas_call(
        kernel,
        out_shape=jax.ShapeDtypeStruct((B, Cout, HW), f32),
        grid=(B,),
        in_specs=[
            pl.BlockSpec((1, Cin, HW), lambda b: (b, 0, 0)),
            pl.BlockSpec(a1.shape, lambda b: (0, 0)),
            pl.BlockSpec(b1.shape, lambda b: (0, 0)),
            pl.BlockSpec(a2.shape, lambda b: (0, 0)),
            pl.BlockSpec(b2.shape, lambda b: (0, 0)),
        ],
        out_specs=pl.BlockSpec((1, Cout, HW), lambda b: (b, 0, 0)),
        scratch_shapes=[
            pltpu.VMEM((Cin, fb), f32),
            pltpu.VMEM((2 * Cmid, mb), f32),
        ],
        compiler_params=pltpu.CompilerParams(
            dimension_semantics=("parallel",)),
    )(x_flat, a1, b1, a2, b2)

    return out_flat.reshape(B, Cout, H, W)                          # NCHW, free


def _ref_forward(x_nchw, params):
    """Pure-JAX reference (lax conv) for correctness checking."""
    w5, b5, w3, b3, wc, bc = params
    x = jnp.transpose(x_nchw, (0, 2, 3, 1))
    dn = ('NHWC', 'HWIO', 'NHWC')
    c5 = jax.lax.conv_general_dilated(x, w5, (1, 1), ((2, 2), (2, 2)),
                                      dimension_numbers=dn) + b5
    c3 = jax.lax.conv_general_dilated(x, w3, (1, 1), ((1, 1), (1, 1)),
                                      dimension_numbers=dn) + b3
    mid = jnp.concatenate([c5, c3], axis=-1)
    out = jax.lax.conv_general_dilated(mid, wc, (1, 1), ((1, 1), (1, 1)),
                                       dimension_numbers=dn) + bc
    return jnp.transpose(jnp.tanh(out), (0, 3, 1, 2))


if __name__ == "__main__":
    key = jax.random.PRNGKey(0)
    B, Cin, H, W = 2, 4, 16, 16
    out_channels = 4
    Cmid = Cin // 2            # use_highway=False -> conv_out_channels = Cin // 2

    ks = jax.random.split(key, 8)

    def uinit(k, shape, fan_in):
        bound = 1.0 / (fan_in ** 0.5)
        return jax.random.uniform(k, shape, jnp.float32, -bound, bound)

    # HWIO weight layout (equivalent to PyTorch OIHW after transpose)
    w5 = uinit(ks[0], (5, 5, Cin, Cmid), Cin * 25)
    b5 = uinit(ks[1], (Cmid,), Cin * 25)
    w3 = uinit(ks[2], (3, 3, Cin, Cmid), Cin * 9)
    b3 = uinit(ks[3], (Cmid,), Cin * 9)
    wc = uinit(ks[4], (3, 3, 2 * Cmid, out_channels), 2 * Cmid * 9)
    bc = uinit(ks[5], (out_channels,), 2 * Cmid * 9)
    params = (w5, b5, w3, b3, wc, bc)

    x = jax.random.normal(ks[6], (B, Cin, H, W), jnp.float32)

    y = highway_output_2d(x, params)
    y = jax.block_until_ready(y)

    y_ref = _ref_forward(x, params)
    assert y.shape == (B, out_channels, H, W)
    assert jnp.allclose(y, y_ref, atol=1e-4, rtol=1e-4), "mismatch vs reference"

    print("KERNEL_OK")
</pallas_src>

<mosaic_0001>
module attributes {stable_mosaic.version = 11 : i64} {
  func.func @_highway_kernel(%arg0: i32, %arg1: memref<1x4x256xf32, #tpu.memory_space<vmem>>, %arg2: memref<4x100xf32, #tpu.memory_space<vmem>>, %arg3: memref<4x1xf32, #tpu.memory_space<vmem>>, %arg4: memref<4x36xf32, #tpu.memory_space<vmem>>, %arg5: memref<4x1xf32, #tpu.memory_space<vmem>>, %arg6: memref<1x4x256xf32, #tpu.memory_space<vmem>>, %arg7: memref<4x324xf32, #tpu.memory_space<vmem>>, %arg8: memref<4x290xf32, #tpu.memory_space<vmem>>) attributes {dimension_semantics = [#tpu.dimension_semantics<parallel>], iteration_bounds = array<i64: 2>, scalar_prefetch = 0 : i64, scratch_operands = 2 : i64, tpu.core_type = #tpu.core_type<tc>, window_params = [{transform_indices = @transform_0, window_bounds = array<i64: 1, 4, 256>}, {pipeline_mode = #tpu.pipeline_mode<synchronous>, transform_indices = @transform_1, window_bounds = array<i64: 4, 100>}, {pipeline_mode = #tpu.pipeline_mode<synchronous>, transform_indices = @transform_2, window_bounds = array<i64: 4, 1>}, {pipeline_mode = #tpu.pipeline_mode<synchronous>, transform_indices = @transform_3, window_bounds = array<i64: 4, 36>}, {pipeline_mode = #tpu.pipeline_mode<synchronous>, transform_indices = @transform_4, window_bounds = array<i64: 4, 1>}, {transform_indices = @transform_5, window_bounds = array<i64: 1, 4, 256>}]} {
    %0 = tpu.iota {dimensions = array<i32: 1>} : vector<1x256xi32>
    %c16_i32 = arith.constant 16 : i32
    %c0_i32 = arith.constant 0 : i32
    %1 = arith.cmpi eq, %c16_i32, %c0_i32 : i32
    %c1_i32 = arith.constant 1 : i32
    %2 = arith.select %1, %c1_i32, %c16_i32 : i32
    %3 = vector.broadcast %2 : i32 to vector<1x256xi32>
    %4 = arith.remsi %0, %3 : vector<1x256xi32>
    %c0_i32_0 = arith.constant 0 : i32
    %5 = vector.broadcast %c0_i32_0 : i32 to vector<1x256xi32>
    %6 = arith.cmpi ne, %4, %5 : vector<1x256xi32>
    %c0_i32_1 = arith.constant 0 : i32
    %7 = vector.broadcast %c0_i32_1 : i32 to vector<1x256xi32>
    %8 = arith.cmpi slt, %4, %7 : vector<1x256xi32>
    %c0_i32_2 = arith.constant 0 : i32
    %9 = arith.cmpi slt, %2, %c0_i32_2 : i32
    %10 = vector.broadcast %9 : i1 to vector<1x256xi1>
    %11 = vector.broadcast %10 : vector<1x256xi1> to vector<1x256xi1>
    %12 = arith.xori %8, %11 : vector<1x256xi1>
    %13 = arith.andi %12, %6 : vector<1x256xi1>
    %14 = vector.broadcast %2 : i32 to vector<1x256xi32>
    %15 = arith.addi %4, %14 : vector<1x256xi32>
    %16 = arith.select %13, %15, %4 : vector<1x256xi1>, vector<1x256xi32>
    %cst = arith.constant 0.000000e+00 : f32
    %17 = vector.broadcast %cst : f32 to vector<4x324xf32>
    %c0 = arith.constant 0 : index
    %c0_3 = arith.constant 0 : index
    %18 = vector.load %arg7[%c0, %c0_3] : memref<4x324xf32, #tpu.memory_space<vmem>>, vector<4x324xf32>
    tpu.vector_store %arg7[%c0, %c0_3], %17 {strides = array<i32>} : memref<4x324xf32, #tpu.memory_space<vmem>>, vector<4x324xf32>,
    %c0_4 = arith.constant 0 : index
    %c0_5 = arith.constant 0 : index
    %c0_6 = arith.constant 0 : index
    %19 = vector.load %arg1[%c0_4, %c0_5, %c0_6] : memref<1x4x256xf32, #tpu.memory_space<vmem>>, vector<1x4x256xf32>
    %20 = vector.shape_cast %19 : vector<1x4x256xf32> to vector<4x256xf32>
    %c0_7 = arith.constant 0 : index
    %c34 = arith.constant 34 : index
    %21 = vector.load %arg7[%c0_7, %c34] : memref<4x324xf32, #tpu.memory_space<vmem>>, vector<4x256xf32>
    tpu.vector_store %arg7[%c0_7, %c34], %20 {strides = array<i32>} : memref<4x324xf32, #tpu.memory_space<vmem>>, vector<4x256xf32>,
    %c0_8 = arith.constant 0 : index
    %c0_9 = arith.constant 0 : index
    %22 = vector.load %arg7[%c0_8, %c0_9] : memref<4x324xf32, #tpu.memory_space<vmem>>, vector<4x324xf32>
    %23 = vector.extract_strided_slice %22 {offsets = [0, 0], sizes = [4, 256], strides = [1, 1]} : vector<4x324xf32> to vector<4x256xf32>
    %c-2_i32 = arith.constant -2 : i32
    %24 = vector.broadcast %c-2_i32 : i32 to vector<1x256xi32>
    %25 = arith.addi %16, %24 : vector<1x256xi32>
    %c0_i32_10 = arith.constant 0 : i32
    %26 = vector.broadcast %c0_i32_10 : i32 to vector<1x256xi32>
    %27 = arith.cmpi sge, %25, %26 : vector<1x256xi32>
    %c-2_i32_11 = arith.constant -2 : i32
    %28 = vector.broadcast %c-2_i32_11 : i32 to vector<1x256xi32>
    %29 = arith.addi %16, %28 : vector<1x256xi32>
    %c16_i32_12 = arith.constant 16 : i32
    %30 = vector.broadcast %c16_i32_12 : i32 to vector<1x256xi32>
    %31 = arith.cmpi slt, %29, %30 : vector<1x256xi32>
    %32 = arith.andi %27, %31 : vector<1x256xi1>
    %cst_13 = arith.constant 0.000000e+00 : f32
    %33 = vector.shape_cast %32 : vector<1x256xi1> to vector<1x256xi1>
    %34 = vector.broadcast %33 : vector<1x256xi1> to vector<4x256xi1>
    %35 = vector.broadcast %cst_13 : f32 to vector<4x256xf32>
    %36 = arith.select %34, %23, %35 : vector<4x256xi1>, vector<4x256xf32>
    %37 = vector.extract_strided_slice %22 {offsets = [0, 1], sizes = [4, 256], strides = [1, 1]} : vector<4x324xf32> to vector<4x256xf32>
    %c-1_i32 = arith.constant -1 : i32
    %38 = vector.broadcast %c-1_i32 : i32 to vector<1x256xi32>
    %39 = arith.addi %16, %38 : vector<1x256xi32>
    %c0_i32_14 = arith.constant 0 : i32
    %40 = vector.broadcast %c0_i32_14 : i32 to vector<1x256xi32>
    %41 = arith.cmpi sge, %39, %40 : vector<1x256xi32>
    %c-1_i32_15 = arith.constant -1 : i32
    %42 = vector.broadcast %c-1_i32_15 : i32 to vector<1x256xi32>
    %43 = arith.addi %16, %42 : vector<1x256xi32>
    %c16_i32_16 = arith.constant 16 : i32
    %44 = vector.broadcast %c16_i32_16 : i32 to vector<1x256xi32>
    %45 = arith.cmpi slt, %43, %44 : vector<1x256xi32>
    %46 = arith.andi %41, %45 : vector<1x256xi1>
    %cst_17 = arith.constant 0.000000e+00 : f32
    %47 = vector.shape_cast %46 : vector<1x256xi1> to vector<1x256xi1>
    %48 = vector.broadcast %47 : vector<1x256xi1> to vector<4x256xi1>
    %49 = vector.broadcast %cst_17 : f32 to vector<4x256xf32>
    %50 = arith.select %48, %37, %49 : vector<4x256xi1>, vector<4x256xf32>
    %51 = vector.extract_strided_slice %22 {offsets = [0, 2], sizes = [4, 256], strides = [1, 1]} : vector<4x324xf32> to vector<4x256xf32>
    %52 = vector.extract_strided_slice %22 {offsets = [0, 3], sizes = [4, 256], strides = [1, 1]} : vector<4x324xf32> to vector<4x256xf32>
    %c1_i32_18 = arith.constant 1 : i32
    %53 = vector.broadcast %c1_i32_18 : i32 to vector<1x256xi32>
    %54 = arith.addi %16, %53 : vector<1x256xi32>
    %c0_i32_19 = arith.constant 0 : i32
    %55 = vector.broadcast %c0_i32_19 : i32 to vector<1x256xi32>
    %56 = arith.cmpi sge, %54, %55 : vector<1x256xi32>
    %c1_i32_20 = arith.constant 1 : i32
    %57 = vector.broadcast %c1_i32_20 : i32 to vector<1x256xi32>
    %58 = arith.addi %16, %57 : vector<1x256xi32>
    %c16_i32_21 = arith.constant 16 : i32
    %59 = vector.broadcast %c16_i32_21 : i32 to vector<1x256xi32>
    %60 = arith.cmpi slt, %58, %59 : vector<1x256xi32>
    %61 = arith.andi %56, %60 : vector<1x256xi1>
    %cst_22 = arith.constant 0.000000e+00 : f32
    %62 = vector.shape_cast %61 : vector<1x256xi1> to vector<1x256xi1>
    %63 = vector.broadcast %62 : vector<1x256xi1> to vector<4x256xi1>
    %64 = vector.broadcast %cst_22 : f32 to vector<4x256xf32>
    %65 = arith.select %63, %52, %64 : vector<4x256xi1>, vector<4x256xf32>
    %66 = vector.extract_strided_slice %22 {offsets = [0, 4], sizes = [4, 256], strides = [1, 1]} : vector<4x324xf32> to vector<4x256xf32>
    %c2_i32 = arith.constant 2 : i32
    %67 = vector.broadcast %c2_i32 : i32 to vector<1x256xi32>
    %68 = arith.addi %16, %67 : vector<1x256xi32>
    %c0_i32_23 = arith.constant 0 : i32
    %69 = vector.broadcast %c0_i32_23 : i32 to vector<1x256xi32>
    %70 = arith.cmpi sge, %68, %69 : vector<1x256xi32>
    %c2_i32_24 = arith.constant 2 : i32
    %71 = vector.broadcast %c2_i32_24 : i32 to vector<1x256xi32>
    %72 = arith.addi %16, %71 : vector<1x256xi32>
    %c16_i32_25 = arith.constant 16 : i32
    %73 = vector.broadcast %c16_i32_25 : i32 to vector<1x256xi32>
    %74 = arith.cmpi slt, %72, %73 : vector<1x256xi32>
    %75 = arith.andi %70, %74 : vector<1x256xi1>
    %cst_26 = arith.constant 0.000000e+00 : f32
    %76 = vector.shape_cast %75 : vector<1x256xi1> to vector<1x256xi1>
    %77 = vector.broadcast %76 : vector<1x256xi1> to vector<4x256xi1>
    %78 = vector.broadcast %cst_26 : f32 to vector<4x256xf32>
    %79 = arith.select %77, %66, %78 : vector<4x256xi1>, vector<4x256xf32>
    %80 = vector.extract_strided_slice %22 {offsets = [0, 16], sizes = [4, 256], strides = [1, 1]} : vector<4x324xf32> to vector<4x256xf32>
    %c-2_i32_27 = arith.constant -2 : i32
    %81 = vector.broadcast %c-2_i32_27 : i32 to vector<1x256xi32>
    %82 = arith.addi %16, %81 : vector<1x256xi32>
    %c0_i32_28 = arith.constant 0 : i32
    %83 = vector.broadcast %c0_i32_28 : i32 to vector<1x256xi32>
    %84 = arith.cmpi sge, %82, %83 : vector<1x256xi32>
    %c-2_i32_29 = arith.constant -2 : i32
    %85 = vector.broadcast %c-2_i32_29 : i32 to vector<1x256xi32>
    %86 = arith.addi %16, %85 : vector<1x256xi32>
    %c16_i32_30 = arith.constant 16 : i32
    %87 = vector.broadcast %c16_i32_30 : i32 to vector<1x256xi32>
    %88 = arith.cmpi slt, %86, %87 : vector<1x256xi32>
    %89 = arith.andi %84, %88 : vector<1x256xi1>
    %cst_31 = arith.constant 0.000000e+00 : f32
    %90 = vector.shape_cast %89 : vector<1x256xi1> to vector<1x256xi1>
    %91 = vector.broadcast %90 : vector<1x256xi1> to vector<4x256xi1>
    %92 = vector.broadcast %cst_31 : f32 to vector<4x256xf32>
    %93 = arith.select %91, %80, %92 : vector<4x256xi1>, vector<4x256xf32>
    %94 = vector.extract_strided_slice %22 {offsets = [0, 17], sizes = [4, 256], strides = [1, 1]} : vector<4x324xf32> to vector<4x256xf32>
    %c-1_i32_32 = arith.constant -1 : i32
    %95 = vector.broadcast %c-1_i32_32 : i32 to vector<1x256xi32>
    %96 = arith.addi %16, %95 : vector<1x256xi32>
    %c0_i32_33 = arith.constant 0 : i32
    %97 = vector.broadcast %c0_i32_33 : i32 to vector<1x256xi32>
    %98 = arith.cmpi sge, %96, %97 : vector<1x256xi32>
    %c-1_i32_34 = arith.constant -1 : i32
    %99 = vector.broadcast %c-1_i32_34 : i32 to vector<1x256xi32>
    %100 = arith.addi %16, %99 : vector<1x256xi32>
    %c16_i32_35 = arith.constant 16 : i32
    %101 = vector.broadcast %c16_i32_35 : i32 to vector<1x256xi32>
    %102 = arith.cmpi slt, %100, %101 : vector<1x256xi32>
    %103 = arith.andi %98, %102 : vector<1x256xi1>
    %cst_36 = arith.constant 0.000000e+00 : f32
    %104 = vector.shape_cast %103 : vector<1x256xi1> to vector<1x256xi1>
    %105 = vector.broadcast %104 : vector<1x256xi1> to vector<4x256xi1>
    %106 = vector.broadcast %cst_36 : f32 to vector<4x256xf32>
    %107 = arith.select %105, %94, %106 : vector<4x256xi1>, vector<4x256xf32>
    %108 = vector.extract_strided_slice %22 {offsets = [0, 18], sizes = [4, 256], strides = [1, 1]} : vector<4x324xf32> to vector<4x256xf32>
    %109 = vector.extract_strided_slice %22 {offsets = [0, 19], sizes = [4, 256], strides = [1, 1]} : vector<4x324xf32> to vector<4x256xf32>
    %c1_i32_37 = arith.constant 1 : i32
    %110 = vector.broadcast %c1_i32_37 : i32 to vector<1x256xi32>
    %111 = arith.addi %16, %110 : vector<1x256xi32>
    %c0_i32_38 = arith.constant 0 : i32
    %112 = vector.broadcast %c0_i32_38 : i32 to vector<1x256xi32>
    %113 = arith.cmpi sge, %111, %112 : vector<1x256xi32>
    %c1_i32_39 = arith.constant 1 : i32
    %114 = vector.broadcast %c1_i32_39 : i32 to vector<1x256xi32>
    %115 = arith.addi %16, %114 : vector<1x256xi32>
    %c16_i32_40 = arith.constant 16 : i32
    %116 = vector.broadcast %c16_i32_40 : i32 to vector<1x256xi32>
    %117 = arith.cmpi slt, %115, %116 : vector<1x256xi32>
    %118 = arith.andi %113, %117 : vector<1x256xi1>
    %cst_41 = arith.constant 0.000000e+00 : f32
    %119 = vector.shape_cast %118 : vector<1x256xi1> to vector<1x256xi1>
    %120 = vector.broadcast %119 : vector<1x256xi1> to vector<4x256xi1>
    %121 = vector.broadcast %cst_41 : f32 to vector<4x256xf32>
    %122 = arith.select %120, %109, %121 : vector<4x256xi1>, vector<4x256xf32>
    %123 = vector.extract_strided_slice %22 {offsets = [0, 20], sizes = [4, 256], strides = [1, 1]} : vector<4x324xf32> to vector<4x256xf32>
    %c2_i32_42 = arith.constant 2 : i32
    %124 = vector.broadcast %c2_i32_42 : i32 to vector<1x256xi32>
    %125 = arith.addi %16, %124 : vector<1x256xi32>
    %c0_i32_43 = arith.constant 0 : i32
    %126 = vector.broadcast %c0_i32_43 : i32 to vector<1x256xi32>
    %127 = arith.cmpi sge, %125, %126 : vector<1x256xi32>
    %c2_i32_44 = arith.constant 2 : i32
    %128 = vector.broadcast %c2_i32_44 : i32 to vector<1x256xi32>
    %129 = arith.addi %16, %128 : vector<1x256xi32>
    %c16_i32_45 = arith.constant 16 : i32
    %130 = vector.broadcast %c16_i32_45 : i32 to vector<1x256xi32>
    %131 = arith.cmpi slt, %129, %130 : vector<1x256xi32>
    %132 = arith.andi %127, %131 : vector<1x256xi1>
    %cst_46 = arith.constant 0.000000e+00 : f32
    %133 = vector.shape_cast %132 : vector<1x256xi1> to vector<1x256xi1>
    %134 = vector.broadcast %133 : vector<1x256xi1> to vector<4x256xi1>
    %135 = vector.broadcast %cst_46 : f32 to vector<4x256xf32>
    %136 = arith.select %134, %123, %135 : vector<4x256xi1>, vector<4x256xf32>
    %137 = vector.extract_strided_slice %22 {offsets = [0, 32], sizes = [4, 256], strides = [1, 1]} : vector<4x324xf32> to vector<4x256xf32>
    %c-2_i32_47 = arith.constant -2 : i32
    %138 = vector.broadcast %c-2_i32_47 : i32 to vector<1x256xi32>
    %139 = arith.addi %16, %138 : vector<1x256xi32>
    %c0_i32_48 = arith.constant 0 : i32
    %140 = vector.broadcast %c0_i32_48 : i32 to vector<1x256xi32>
    %141 = arith.cmpi sge, %139, %140 : vector<1x256xi32>
    %c-2_i32_49 = arith.constant -2 : i32
    %142 = vector.broadcast %c-2_i32_49 : i32 to vector<1x256xi32>
    %143 = arith.addi %16, %142 : vector<1x256xi32>
    %c16_i32_50 = arith.constant 16 : i32
    %144 = vector.broadcast %c16_i32_50 : i32 to vector<1x256xi32>
    %145 = arith.cmpi slt, %143, %144 : vector<1x256xi32>
    %146 = arith.andi %141, %145 : vector<1x256xi1>
    %cst_51 = arith.constant 0.000000e+00 : f32
    %147 = vector.shape_cast %146 : vector<1x256xi1> to vector<1x256xi1>
    %148 = vector.broadcast %147 : vector<1x256xi1> to vector<4x256xi1>
    %149 = vector.broadcast %cst_51 : f32 to vector<4x256xf32>
    %150 = arith.select %148, %137, %149 : vector<4x256xi1>, vector<4x256xf32>
    %151 = vector.extract_strided_slice %22 {offsets = [0, 33], sizes = [4, 256], strides = [1, 1]} : vector<4x324xf32> to vector<4x256xf32>
    %c-1_i32_52 = arith.constant -1 : i32
    %152 = vector.broadcast %c-1_i32_52 : i32 to vector<1x256xi32>
    %153 = arith.addi %16, %152 : vector<1x256xi32>
    %c0_i32_53 = arith.constant 0 : i32
    %154 = vector.broadcast %c0_i32_53 : i32 to vector<1x256xi32>
    %155 = arith.cmpi sge, %153, %154 : vector<1x256xi32>
    %c-1_i32_54 = arith.constant -1 : i32
    %156 = vector.broadcast %c-1_i32_54 : i32 to vector<1x256xi32>
    %157 = arith.addi %16, %156 : vector<1x256xi32>
    %c16_i32_55 = arith.constant 16 : i32
    %158 = vector.broadcast %c16_i32_55 : i32 to vector<1x256xi32>
    %159 = arith.cmpi slt, %157, %158 : vector<1x256xi32>
    %160 = arith.andi %155, %159 : vector<1x256xi1>
    %cst_56 = arith.constant 0.000000e+00 : f32
    %161 = vector.shape_cast %160 : vector<1x256xi1> to vector<1x256xi1>
    %162 = vector.broadcast %161 : vector<1x256xi1> to vector<4x256xi1>
    %163 = vector.broadcast %cst_56 : f32 to vector<4x256xf32>
    %164 = arith.select %162, %151, %163 : vector<4x256xi1>, vector<4x256xf32>
    %165 = vector.extract_strided_slice %22 {offsets = [0, 34], sizes = [4, 256], strides = [1, 1]} : vector<4x324xf32> to vector<4x256xf32>
    %166 = vector.extract_strided_slice %22 {offsets = [0, 35], sizes = [4, 256], strides = [1, 1]} : vector<4x324xf32> to vector<4x256xf32>
    %c1_i32_57 = arith.constant 1 : i32
    %167 = vector.broadcast %c1_i32_57 : i32 to vector<1x256xi32>
    %168 = arith.addi %16, %167 : vector<1x256xi32>
    %c0_i32_58 = arith.constant 0 : i32
    %169 = vector.broadcast %c0_i32_58 : i32 to vector<1x256xi32>
    %170 = arith.cmpi sge, %168, %169 : vector<1x256xi32>
    %c1_i32_59 = arith.constant 1 : i32
    %171 = vector.broadcast %c1_i32_59 : i32 to vector<1x256xi32>
    %172 = arith.addi %16, %171 : vector<1x256xi32>
    %c16_i32_60 = arith.constant 16 : i32
    %173 = vector.broadcast %c16_i32_60 : i32 to vector<1x256xi32>
    %174 = arith.cmpi slt, %172, %173 : vector<1x256xi32>
    %175 = arith.andi %170, %174 : vector<1x256xi1>
    %cst_61 = arith.constant 0.000000e+00 : f32
    %176 = vector.shape_cast %175 : vector<1x256xi1> to vector<1x256xi1>
    %177 = vector.broadcast %176 : vector<1x256xi1> to vector<4x256xi1>
    %178 = vector.broadcast %cst_61 : f32 to vector<4x256xf32>
    %179 = arith.select %177, %166, %178 : vector<4x256xi1>, vector<4x256xf32>
    %180 = vector.extract_strided_slice %22 {offsets = [0, 36], sizes = [4, 256], strides = [1, 1]} : vector<4x324xf32> to vector<4x256xf32>
    %c2_i32_62 = arith.constant 2 : i32
    %181 = vector.broadcast %c2_i32_62 : i32 to vector<1x256xi32>
    %182 = arith.addi %16, %181 : vector<1x256xi32>
    %c0_i32_63 = arith.constant 0 : i32
    %183 = vector.broadcast %c0_i32_63 : i32 to vector<1x256xi32>
    %184 = arith.cmpi sge, %182, %183 : vector<1x256xi32>
    %c2_i32_64 = arith.constant 2 : i32
    %185 = vector.broadcast %c2_i32_64 : i32 to vector<1x256xi32>
    %186 = arith.addi %16, %185 : vector<1x256xi32>
    %c16_i32_65 = arith.constant 16 : i32
    %187 = vector.broadcast %c16_i32_65 : i32 to vector<1x256xi32>
    %188 = arith.cmpi slt, %186, %187 : vector<1x256xi32>
    %189 = arith.andi %184, %188 : vector<1x256xi1>
    %cst_66 = arith.constant 0.000000e+00 : f32
    %190 = vector.shape_cast %189 : vector<1x256xi1> to vector<1x256xi1>
    %191 = vector.broadcast %190 : vector<1x256xi1> to vector<4x256xi1>
    %192 = vector.broadcast %cst_66 : f32 to vector<4x256xf32>
    %193 = arith.select %191, %180, %192 : vector<4x256xi1>, vector<4x256xf32>
    %194 = vector.extract_strided_slice %22 {offsets = [0, 48], sizes = [4, 256], strides = [1, 1]} : vector<4x324xf32> to vector<4x256xf32>
    %c-2_i32_67 = arith.constant -2 : i32
    %195 = vector.broadcast %c-2_i32_67 : i32 to vector<1x256xi32>
    %196 = arith.addi %16, %195 : vector<1x256xi32>
    %c0_i32_68 = arith.constant 0 : i32
    %197 = vector.broadcast %c0_i32_68 : i32 to vector<1x256xi32>
    %198 = arith.cmpi sge, %196, %197 : vector<1x256xi32>
    %c-2_i32_69 = arith.constant -2 : i32
    %199 = vector.broadcast %c-2_i32_69 : i32 to vector<1x256xi32>
    %200 = arith.addi %16, %199 : vector<1x256xi32>
    %c16_i32_70 = arith.constant 16 : i32
    %201 = vector.broadcast %c16_i32_70 : i32 to vector<1x256xi32>
    %202 = arith.cmpi slt, %200, %201 : vector<1x256xi32>
    %203 = arith.andi %198, %202 : vector<1x256xi1>
    %cst_71 = arith.constant 0.000000e+00 : f32
    %204 = vector.shape_cast %203 : vector<1x256xi1> to vector<1x256xi1>
    %205 = vector.broadcast %204 : vector<1x256xi1> to vector<4x256xi1>
    %206 = vector.broadcast %cst_71 : f32 to vector<4x256xf32>
    %207 = arith.select %205, %194, %206 : vector<4x256xi1>, vector<4x256xf32>
    %208 = vector.extract_strided_slice %22 {offsets = [0, 49], sizes = [4, 256], strides = [1, 1]} : vector<4x324xf32> to vector<4x256xf32>
    %c-1_i32_72 = arith.constant -1 : i32
    %209 = vector.broadcast %c-1_i32_72 : i32 to vector<1x256xi32>
    %210 = arith.addi %16, %209 : vector<1x256xi32>
    %c0_i32_73 = arith.constant 0 : i32
    %211 = vector.broadcast %c0_i32_73 : i32 to vector<1x256xi32>
    %212 = arith.cmpi sge, %210, %211 : vector<1x256xi32>
    %c-1_i32_74 = arith.constant -1 : i32
    %213 = vector.broadcast %c-1_i32_74 : i32 to vector<1x256xi32>
    %214 = arith.addi %16, %213 : vector<1x256xi32>
    %c16_i32_75 = arith.constant 16 : i32
    %215 = vector.broadcast %c16_i32_75 : i32 to vector<1x256xi32>
    %216 = arith.cmpi slt, %214, %215 : vector<1x256xi32>
    %217 = arith.andi %212, %216 : vector<1x256xi1>
    %cst_76 = arith.constant 0.000000e+00 : f32
    %218 = vector.shape_cast %217 : vector<1x256xi1> to vector<1x256xi1>
    %219 = vector.broadcast %218 : vector<1x256xi1> to vector<4x256xi1>
    %220 = vector.broadcast %cst_76 : f32 to vector<4x256xf32>
    %221 = arith.select %219, %208, %220 : vector<4x256xi1>, vector<4x256xf32>
    %222 = vector.extract_strided_slice %22 {offsets = [0, 50], sizes = [4, 256], strides = [1, 1]} : vector<4x324xf32> to vector<4x256xf32>
    %223 = vector.extract_strided_slice %22 {offsets = [0, 51], sizes = [4, 256], strides = [1, 1]} : vector<4x324xf32> to vector<4x256xf32>
    %c1_i32_77 = arith.constant 1 : i32
    %224 = vector.broadcast %c1_i32_77 : i32 to vector<1x256xi32>
    %225 = arith.addi %16, %224 : vector<1x256xi32>
    %c0_i32_78 = arith.constant 0 : i32
    %226 = vector.broadcast %c0_i32_78 : i32 to vector<1x256xi32>
    %227 = arith.cmpi sge, %225, %226 : vector<1x256xi32>
    %c1_i32_79 = arith.constant 1 : i32
    %228 = vector.broadcast %c1_i32_79 : i32 to vector<1x256xi32>
    %229 = arith.addi %16, %228 : vector<1x256xi32>
    %c16_i32_80 = arith.constant 16 : i32
    %230 = vector.broadcast %c16_i32_80 : i32 to vector<1x256xi32>
    %231 = arith.cmpi slt, %229, %230 : vector<1x256xi32>
    %232 = arith.andi %227, %231 : vector<1x256xi1>
    %cst_81 = arith.constant 0.000000e+00 : f32
    %233 = vector.shape_cast %232 : vector<1x256xi1> to vector<1x256xi1>
    %234 = vector.broadcast %233 : vector<1x256xi1> to vector<4x256xi1>
    %235 = vector.broadcast %cst_81 : f32 to vector<4x256xf32>
    %236 = arith.select %234, %223, %235 : vector<4x256xi1>, vector<4x256xf32>
    %237 = vector.extract_strided_slice %22 {offsets = [0, 52], sizes = [4, 256], strides = [1, 1]} : vector<4x324xf32> to vector<4x256xf32>
    %c2_i32_82 = arith.constant 2 : i32
    %238 = vector.broadcast %c2_i32_82 : i32 to vector<1x256xi32>
    %239 = arith.addi %16, %238 : vector<1x256xi32>
    %c0_i32_83 = arith.constant 0 : i32
    %240 = vector.broadcast %c0_i32_83 : i32 to vector<1x256xi32>
    %241 = arith.cmpi sge, %239, %240 : vector<1x256xi32>
    %c2_i32_84 = arith.constant 2 : i32
    %242 = vector.broadcast %c2_i32_84 : i32 to vector<1x256xi32>
    %243 = arith.addi %16, %242 : vector<1x256xi32>
    %c16_i32_85 = arith.constant 16 : i32
    %244 = vector.broadcast %c16_i32_85 : i32 to vector<1x256xi32>
    %245 = arith.cmpi slt, %243, %244 : vector<1x256xi32>
    %246 = arith.andi %241, %245 : vector<1x256xi1>
    %cst_86 = arith.constant 0.000000e+00 : f32
    %247 = vector.shape_cast %246 : vector<1x256xi1> to vector<1x256xi1>
    %248 = vector.broadcast %247 : vector<1x256xi1> to vector<4x256xi1>
    %249 = vector.broadcast %cst_86 : f32 to vector<4x256xf32>
    %250 = arith.select %248, %237, %249 : vector<4x256xi1>, vector<4x256xf32>
    %251 = vector.extract_strided_slice %22 {offsets = [0, 64], sizes = [4, 256], strides = [1, 1]} : vector<4x324xf32> to vector<4x256xf32>
    %c-2_i32_87 = arith.constant -2 : i32
    %252 = vector.broadcast %c-2_i32_87 : i32 to vector<1x256xi32>
    %253 = arith.addi %16, %252 : vector<1x256xi32>
    %c0_i32_88 = arith.constant 0 : i32
    %254 = vector.broadcast %c0_i32_88 : i32 to vector<1x256xi32>
    %255 = arith.cmpi sge, %253, %254 : vector<1x256xi32>
    %c-2_i32_89 = arith.constant -2 : i32
    %256 = vector.broadcast %c-2_i32_89 : i32 to vector<1x256xi32>
    %257 = arith.addi %16, %256 : vector<1x256xi32>
    %c16_i32_90 = arith.constant 16 : i32
    %258 = vector.broadcast %c16_i32_90 : i32 to vector<1x256xi32>
    %259 = arith.cmpi slt, %257, %258 : vector<1x256xi32>
    %260 = arith.andi %255, %259 : vector<1x256xi1>
    %cst_91 = arith.constant 0.000000e+00 : f32
    %261 = vector.shape_cast %260 : vector<1x256xi1> to vector<1x256xi1>
    %262 = vector.broadcast %261 : vector<1x256xi1> to vector<4x256xi1>
    %263 = vector.broadcast %cst_91 : f32 to vector<4x256xf32>
    %264 = arith.select %262, %251, %263 : vector<4x256xi1>, vector<4x256xf32>
    %265 = vector.extract_strided_slice %22 {offsets = [0, 65], sizes = [4, 256], strides = [1, 1]} : vector<4x324xf32> to vector<4x256xf32>
    %c-1_i32_92 = arith.constant -1 : i32
    %266 = vector.broadcast %c-1_i32_92 : i32 to vector<1x256xi32>
    %267 = arith.addi %16, %266 : vector<1x256xi32>
    %c0_i32_93 = arith.constant 0 : i32
    %268 = vector.broadcast %c0_i32_93 : i32 to vector<1x256xi32>
    %269 = arith.cmpi sge, %267, %268 : vector<1x256xi32>
    %c-1_i32_94 = arith.constant -1 : i32
    %270 = vector.broadcast %c-1_i32_94 : i32 to vector<1x256xi32>
    %271 = arith.addi %16, %270 : vector<1x256xi32>
    %c16_i32_95 = arith.constant 16 : i32
    %272 = vector.broadcast %c16_i32_95 : i32 to vector<1x256xi32>
    %273 = arith.cmpi slt, %271, %272 : vector<1x256xi32>
    %274 = arith.andi %269, %273 : vector<1x256xi1>
    %cst_96 = arith.constant 0.000000e+00 : f32
    %275 = vector.shape_cast %274 : vector<1x256xi1> to vector<1x256xi1>
    %276 = vector.broadcast %275 : vector<1x256xi1> to vector<4x256xi1>
    %277 = vector.broadcast %cst_96 : f32 to vector<4x256xf32>
    %278 = arith.select %276, %265, %277 : vector<4x256xi1>, vector<4x256xf32>
    %279 = vector.extract_strided_slice %22 {offsets = [0, 66], sizes = [4, 256], strides = [1, 1]} : vector<4x324xf32> to vector<4x256xf32>
    %280 = vector.extract_strided_slice %22 {offsets = [0, 67], sizes = [4, 256], strides = [1, 1]} : vector<4x324xf32> to vector<4x256xf32>
    %c1_i32_97 = arith.constant 1 : i32
    %281 = vector.broadcast %c1_i32_97 : i32 to vector<1x256xi32>
    %282 = arith.addi %16, %281 : vector<1x256xi32>
    %c0_i32_98 = arith.constant 0 : i32
    %283 = vector.broadcast %c0_i32_98 : i32 to vector<1x256xi32>
    %284 = arith.cmpi sge, %282, %283 : vector<1x256xi32>
    %c1_i32_99 = arith.constant 1 : i32
    %285 = vector.broadcast %c1_i32_99 : i32 to vector<1x256xi32>
    %286 = arith.addi %16, %285 : vector<1x256xi32>
    %c16_i32_100 = arith.constant 16 : i32
    %287 = vector.broadcast %c16_i32_100 : i32 to vector<1x256xi32>
    %288 = arith.cmpi slt, %286, %287 : vector<1x256xi32>
    %289 = arith.andi %284, %288 : vector<1x256xi1>
    %cst_101 = arith.constant 0.000000e+00 : f32
    %290 = vector.shape_cast %289 : vector<1x256xi1> to vector<1x256xi1>
    %291 = vector.broadcast %290 : vector<1x256xi1> to vector<4x256xi1>
    %292 = vector.broadcast %cst_101 : f32 to vector<4x256xf32>
    %293 = arith.select %291, %280, %292 : vector<4x256xi1>, vector<4x256xf32>
    %294 = vector.extract_strided_slice %22 {offsets = [0, 68], sizes = [4, 256], strides = [1, 1]} : vector<4x324xf32> to vector<4x256xf32>
    %c2_i32_102 = arith.constant 2 : i32
    %295 = vector.broadcast %c2_i32_102 : i32 to vector<1x256xi32>
    %296 = arith.addi %16, %295 : vector<1x256xi32>
    %c0_i32_103 = arith.constant 0 : i32
    %297 = vector.broadcast %c0_i32_103 : i32 to vector<1x256xi32>
    %298 = arith.cmpi sge, %296, %297 : vector<1x256xi32>
    %c2_i32_104 = arith.constant 2 : i32
    %299 = vector.broadcast %c2_i32_104 : i32 to vector<1x256xi32>
    %300 = arith.addi %16, %299 : vector<1x256xi32>
    %c16_i32_105 = arith.constant 16 : i32
    %301 = vector.broadcast %c16_i32_105 : i32 to vector<1x256xi32>
    %302 = arith.cmpi slt, %300, %301 : vector<1x256xi32>
    %303 = arith.andi %298, %302 : vector<1x256xi1>
    %cst_106 = arith.constant 0.000000e+00 : f32
    %304 = vector.shape_cast %303 : vector<1x256xi1> to vector<1x256xi1>
    %305 = vector.broadcast %304 : vector<1x256xi1> to vector<4x256xi1>
    %306 = vector.broadcast %cst_106 : f32 to vector<4x256xf32>
    %307 = arith.select %305, %294, %306 : vector<4x256xi1>, vector<4x256xf32>
    %308 = tpu.concatenate %36, %50, %51, %65, %79, %93, %107, %108, %122, %136, %150, %164, %165, %179, %193, %207 in 0 : vector<4x256xf32>, vector<4x256xf32>, vector<4x256xf32>, vector<4x256xf32>, vector<4x256xf32>, vector<4x256xf32>, vector<4x256xf32>, vector<4x256xf32>, vector<4x256xf32>, vector<4x256xf32>, vector<4x256xf32>, vector<4x256xf32>, vector<4x256xf32>, vector<4x256xf32>, vector<4x256xf32>, vector<4x256xf32> -> vector<64x256xf32>
    %309 = tpu.concatenate %221, %222, %236, %250, %264, %278, %279, %293, %307 in 0 : vector<4x256xf32>, vector<4x256xf32>, vector<4x256xf32>, vector<4x256xf32>, vector<4x256xf32>, vector<4x256xf32>, vector<4x256xf32>, vector<4x256xf32>, vector<4x256xf32> -> vector<36x256xf32>
    %310 = tpu.concatenate %308, %309 in 0 : vector<64x256xf32>, vector<36x256xf32> -> vector<100x256xf32>
    %c0_107 = arith.constant 0 : index
    %c0_108 = arith.constant 0 : index
    %311 = vector.load %arg2[%c0_107, %c0_108] : memref<4x100xf32, #tpu.memory_space<vmem>>, vector<4x100xf32>
    %cst_109 = arith.constant dense<0.000000e+00> : vector<4x256xf32>
    %312 = tpu.matmul %311, %310, %cst_109 {dimension_numbers = #tpu.dot_dimension_numbers<[1], [0], [0], [1], [0, 0, 1, 1], [], []>} : vector<4x100xf32>, vector<100x256xf32>, vector<4x256xf32> -> vector<4x256xf32>
    %c0_110 = arith.constant 0 : index
    %c0_111 = arith.constant 0 : index
    %313 = vector.load %arg3[%c0_110, %c0_111] : memref<4x1xf32, #tpu.memory_space<vmem>>, vector<4x1xf32>
    %314 = vector.broadcast %313 : vector<4x1xf32> to vector<4x256xf32>
    %315 = arith.addf %312, %314 : vector<4x256xf32>
    %cst_112 = arith.constant 0.000000e+00 : f32
    %316 = vector.broadcast %cst_112 : f32 to vector<4x290xf32>
    %c0_113 = arith.constant 0 : index
    %c0_114 = arith.constant 0 : index
    %317 = vector.load %arg8[%c0_113, %c0_114] : memref<4x290xf32, #tpu.memory_space<vmem>>, vector<4x290xf32>
    tpu.vector_store %arg8[%c0_113, %c0_114], %316 {strides = array<i32>} : memref<4x290xf32, #tpu.memory_space<vmem>>, vector<4x290xf32>,
    %c0_115 = arith.constant 0 : index
    %c17 = arith.constant 17 : index
    %318 = vector.load %arg8[%c0_115, %c17] : memref<4x290xf32, #tpu.memory_space<vmem>>, vector<4x256xf32>
    tpu.vector_store %arg8[%c0_115, %c17], %315 {strides = array<i32>} : memref<4x290xf32, #tpu.memory_space<vmem>>, vector<4x256xf32>,
    %c0_116 = arith.constant 0 : index
    %c0_117 = arith.constant 0 : index
    %319 = vector.load %arg8[%c0_116, %c0_117] : memref<4x290xf32, #tpu.memory_space<vmem>>, vector<4x290xf32>
    %320 = vector.extract_strided_slice %319 {offsets = [0, 0], sizes = [4, 256], strides = [1, 1]} : vector<4x290xf32> to vector<4x256xf32>
    %c-1_i32_118 = arith.constant -1 : i32
    %321 = vector.broadcast %c-1_i32_118 : i32 to vector<1x256xi32>
    %322 = arith.addi %16, %321 : vector<1x256xi32>
    %c0_i32_119 = arith.constant 0 : i32
    %323 = vector.broadcast %c0_i32_119 : i32 to vector<1x256xi32>
    %324 = arith.cmpi sge, %322, %323 : vector<1x256xi32>
    %c-1_i32_120 = arith.constant -1 : i32
    %325 = vector.broadcast %c-1_i32_120 : i32 to vector<1x256xi32>
    %326 = arith.addi %16, %325 : vector<1x256xi32>
    %c16_i32_121 = arith.constant 16 : i32
    %327 = vector.broadcast %c16_i32_121 : i32 to vector<1x256xi32>
    %328 = arith.cmpi slt, %326, %327 : vector<1x256xi32>
    %329 = arith.andi %324, %328 : vector<1x256xi1>
    %cst_122 = arith.constant 0.000000e+00 : f32
    %330 = vector.shape_cast %329 : vector<1x256xi1> to vector<1x256xi1>
    %331 = vector.broadcast %330 : vector<1x256xi1> to vector<4x256xi1>
    %332 = vector.broadcast %cst_122 : f32 to vector<4x256xf32>
    %333 = arith.select %331, %320, %332 : vector<4x256xi1>, vector<4x256xf32>
    %334 = vector.extract_strided_slice %319 {offsets = [0, 1], sizes = [4, 256], strides = [1, 1]} : vector<4x290xf32> to vector<4x256xf32>
    %335 = vector.extract_strided_slice %319 {offsets = [0, 2], sizes = [4, 256], strides = [1, 1]} : vector<4x290xf32> to vector<4x256xf32>
    %c1_i32_123 = arith.constant 1 : i32
    %336 = vector.broadcast %c1_i32_123 : i32 to vector<1x256xi32>
    %337 = arith.addi %16, %336 : vector<1x256xi32>
    %c0_i32_124 = arith.constant 0 : i32
    %338 = vector.broadcast %c0_i32_124 : i32 to vector<1x256xi32>
    %339 = arith.cmpi sge, %337, %338 : vector<1x256xi32>
    %c1_i32_125 = arith.constant 1 : i32
    %340 = vector.broadcast %c1_i32_125 : i32 to vector<1x256xi32>
    %341 = arith.addi %16, %340 : vector<1x256xi32>
    %c16_i32_126 = arith.constant 16 : i32
    %342 = vector.broadcast %c16_i32_126 : i32 to vector<1x256xi32>
    %343 = arith.cmpi slt, %341, %342 : vector<1x256xi32>
    %344 = arith.andi %339, %343 : vector<1x256xi1>
    %cst_127 = arith.constant 0.000000e+00 : f32
    %345 = vector.shape_cast %344 : vector<1x256xi1> to vector<1x256xi1>
    %346 = vector.broadcast %345 : vector<1x256xi1> to vector<4x256xi1>
    %347 = vector.broadcast %cst_127 : f32 to vector<4x256xf32>
    %348 = arith.select %346, %335, %347 : vector<4x256xi1>, vector<4x256xf32>
    %349 = vector.extract_strided_slice %319 {offsets = [0, 16], sizes = [4, 256], strides = [1, 1]} : vector<4x290xf32> to vector<4x256xf32>
    %c-1_i32_128 = arith.constant -1 : i32
    %350 = vector.broadcast %c-1_i32_128 : i32 to vector<1x256xi32>
    %351 = arith.addi %16, %350 : vector<1x256xi32>
    %c0_i32_129 = arith.constant 0 : i32
    %352 = vector.broadcast %c0_i32_129 : i32 to vector<1x256xi32>
    %353 = arith.cmpi sge, %351, %352 : vector<1x256xi32>
    %c-1_i32_130 = arith.constant -1 : i32
    %354 = vector.broadcast %c-1_i32_130 : i32 to vector<1x256xi32>
    %355 = arith.addi %16, %354 : vector<1x256xi32>
    %c16_i32_131 = arith.constant 16 : i32
    %356 = vector.broadcast %c16_i32_131 : i32 to vector<1x256xi32>
    %357 = arith.cmpi slt, %355, %356 : vector<1x256xi32>
    %358 = arith.andi %353, %357 : vector<1x256xi1>
    %cst_132 = arith.constant 0.000000e+00 : f32
    %359 = vector.shape_cast %358 : vector<1x256xi1> to vector<1x256xi1>
    %360 = vector.broadcast %359 : vector<1x256xi1> to vector<4x256xi1>
    %361 = vector.broadcast %cst_132 : f32 to vector<4x256xf32>
    %362 = arith.select %360, %349, %361 : vector<4x256xi1>, vector<4x256xf32>
    %363 = vector.extract_strided_slice %319 {offsets = [0, 17], sizes = [4, 256], strides = [1, 1]} : vector<4x290xf32> to vector<4x256xf32>
    %364 = vector.extract_strided_slice %319 {offsets = [0, 18], sizes = [4, 256], strides = [1, 1]} : vector<4x290xf32> to vector<4x256xf32>
    %c1_i32_133 = arith.constant 1 : i32
    %365 = vector.broadcast %c1_i32_133 : i32 to vector<1x256xi32>
    %366 = arith.addi %16, %365 : vector<1x256xi32>
    %c0_i32_134 = arith.constant 0 : i32
    %367 = vector.broadcast %c0_i32_134 : i32 to vector<1x256xi32>
    %368 = arith.cmpi sge, %366, %367 : vector<1x256xi32>
    %c1_i32_135 = arith.constant 1 : i32
    %369 = vector.broadcast %c1_i32_135 : i32 to vector<1x256xi32>
    %370 = arith.addi %16, %369 : vector<1x256xi32>
    %c16_i32_136 = arith.constant 16 : i32
    %371 = vector.broadcast %c16_i32_136 : i32 to vector<1x256xi32>
    %372 = arith.cmpi slt, %370, %371 : vector<1x256xi32>
    %373 = arith.andi %368, %372 : vector<1x256xi1>
    %cst_137 = arith.constant 0.000000e+00 : f32
    %374 = vector.shape_cast %373 : vector<1x256xi1> to vector<1x256xi1>
    %375 = vector.broadcast %374 : vector<1x256xi1> to vector<4x256xi1>
    %376 = vector.broadcast %cst_137 : f32 to vector<4x256xf32>
    %377 = arith.select %375, %364, %376 : vector<4x256xi1>, vector<4x256xf32>
    %378 = vector.extract_strided_slice %319 {offsets = [0, 32], sizes = [4, 256], strides = [1, 1]} : vector<4x290xf32> to vector<4x256xf32>
    %c-1_i32_138 = arith.constant -1 : i32
    %379 = vector.broadcast %c-1_i32_138 : i32 to vector<1x256xi32>
    %380 = arith.addi %16, %379 : vector<1x256xi32>
    %c0_i32_139 = arith.constant 0 : i32
    %381 = vector.broadcast %c0_i32_139 : i32 to vector<1x256xi32>
    %382 = arith.cmpi sge, %380, %381 : vector<1x256xi32>
    %c-1_i32_140 = arith.constant -1 : i32
    %383 = vector.broadcast %c-1_i32_140 : i32 to vector<1x256xi32>
    %384 = arith.addi %16, %383 : vector<1x256xi32>
    %c16_i32_141 = arith.constant 16 : i32
    %385 = vector.broadcast %c16_i32_141 : i32 to vector<1x256xi32>
    %386 = arith.cmpi slt, %384, %385 : vector<1x256xi32>
    %387 = arith.andi %382, %386 : vector<1x256xi1>
    %cst_142 = arith.constant 0.000000e+00 : f32
    %388 = vector.shape_cast %387 : vector<1x256xi1> to vector<1x256xi1>
    %389 = vector.broadcast %388 : vector<1x256xi1> to vector<4x256xi1>
    %390 = vector.broadcast %cst_142 : f32 to vector<4x256xf32>
    %391 = arith.select %389, %378, %390 : vector<4x256xi1>, vector<4x256xf32>
    %392 = vector.extract_strided_slice %319 {offsets = [0, 33], sizes = [4, 256], strides = [1, 1]} : vector<4x290xf32> to vector<4x256xf32>
    %393 = vector.extract_strided_slice %319 {offsets = [0, 34], sizes = [4, 256], strides = [1, 1]} : vector<4x290xf32> to vector<4x256xf32>
    %c1_i32_143 = arith.constant 1 : i32
    %394 = vector.broadcast %c1_i32_143 : i32 to vector<1x256xi32>
    %395 = arith.addi %16, %394 : vector<1x256xi32>
    %c0_i32_144 = arith.constant 0 : i32
    %396 = vector.broadcast %c0_i32_144 : i32 to vector<1x256xi32>
    %397 = arith.cmpi sge, %395, %396 : vector<1x256xi32>
    %c1_i32_145 = arith.constant 1 : i32
    %398 = vector.broadcast %c1_i32_145 : i32 to vector<1x256xi32>
    %399 = arith.addi %16, %398 : vector<1x256xi32>
    %c16_i32_146 = arith.constant 16 : i32
    %400 = vector.broadcast %c16_i32_146 : i32 to vector<1x256xi32>
    %401 = arith.cmpi slt, %399, %400 : vector<1x256xi32>
    %402 = arith.andi %397, %401 : vector<1x256xi1>
    %cst_147 = arith.constant 0.000000e+00 : f32
    %403 = vector.shape_cast %402 : vector<1x256xi1> to vector<1x256xi1>
    %404 = vector.broadcast %403 : vector<1x256xi1> to vector<4x256xi1>
    %405 = vector.broadcast %cst_147 : f32 to vector<4x256xf32>
    %406 = arith.select %404, %393, %405 : vector<4x256xi1>, vector<4x256xf32>
    %407 = tpu.concatenate %333, %334, %348, %362, %363, %377, %391, %392, %406 in 0 : vector<4x256xf32>, vector<4x256xf32>, vector<4x256xf32>, vector<4x256xf32>, vector<4x256xf32>, vector<4x256xf32>, vector<4x256xf32>, vector<4x256xf32>, vector<4x256xf32> -> vector<36x256xf32>
    %c0_148 = arith.constant 0 : index
    %c0_149 = arith.constant 0 : index
    %408 = vector.load %arg4[%c0_148, %c0_149] : memref<4x36xf32, #tpu.memory_space<vmem>>, vector<4x36xf32>
    %cst_150 = arith.constant dense<0.000000e+00> : vector<4x256xf32>
    %409 = tpu.matmul %408, %407, %cst_150 {dimension_numbers = #tpu.dot_dimension_numbers<[1], [0], [0], [1], [0, 0, 1, 1], [], []>} : vector<4x36xf32>, vector<36x256xf32>, vector<4x256xf32> -> vector<4x256xf32>
    %c0_151 = arith.constant 0 : index
    %c0_152 = arith.constant 0 : index
    %410 = vector.load %arg5[%c0_151, %c0_152] : memref<4x1xf32, #tpu.memory_space<vmem>>, vector<4x1xf32>
    %411 = vector.broadcast %410 : vector<4x1xf32> to vector<4x256xf32>
    %412 = arith.addf %409, %411 : vector<4x256xf32>
    %413 = math.tanh %412 : vector<4x256xf32>
    %c0_153 = arith.constant 0 : index
    %c0_154 = arith.constant 0 : index
    %c0_155 = arith.constant 0 : index
    %414 = vector.load %arg6[%c0_153, %c0_154, %c0_155] : memref<1x4x256xf32, #tpu.memory_space<vmem>>, vector<1x4x256xf32>
    %415 = vector.shape_cast %414 : vector<1x4x256xf32> to vector<4x256xf32>
    %416 = vector.shape_cast %413 : vector<4x256xf32> to vector<1x4x256xf32>
    tpu.vector_store %arg6[%c0_153, %c0_154, %c0_155], %416 {strides = array<i32>} : memref<1x4x256xf32, #tpu.memory_space<vmem>>, vector<1x4x256xf32>,
    return
  }
  func.func @transform_0(%arg0: i32) -> (i32, i32, i32) {
    %c0_i32 = arith.constant 0 : i32
    %c0_i32_0 = arith.constant 0 : i32
    %c0_i32_1 = arith.constant 0 : i32
    return %arg0, %c0_i32, %c0_i32_0 : i32, i32, i32
  }
  func.func @transform_1(%arg0: i32) -> (i32, i32) {
    %c0_i32 = arith.constant 0 : i32
    %c0_i32_0 = arith.constant 0 : i32
    %c0_i32_1 = arith.constant 0 : i32
    return %c0_i32, %c0_i32_0 : i32, i32
  }
  func.func @transform_2(%arg0: i32) -> (i32, i32) {
    %c0_i32 = arith.constant 0 : i32
    %c0_i32_0 = arith.constant 0 : i32
    %c0_i32_1 = arith.constant 0 : i32
    return %c0_i32, %c0_i32_0 : i32, i32
  }
  func.func @transform_3(%arg0: i32) -> (i32, i32) {
    %c0_i32 = arith.constant 0 : i32
    %c0_i32_0 = arith.constant 0 : i32
    %c0_i32_1 = arith.constant 0 : i32
    return %c0_i32, %c0_i32_0 : i32, i32
  }
  func.func @transform_4(%arg0: i32) -> (i32, i32) {
    %c0_i32 = arith.constant 0 : i32
    %c0_i32_0 = arith.constant 0 : i32
    %c0_i32_1 = arith.constant 0 : i32
    return %c0_i32, %c0_i32_0 : i32, i32
  }
  func.func @transform_5(%arg0: i32) -> (i32, i32, i32) {
    %c0_i32 = arith.constant 0 : i32
    %c0_i32_0 = arith.constant 0 : i32
    %c0_i32_1 = arith.constant 0 : i32
    return %arg0, %c0_i32, %c0_i32_0 : i32, i32, i32
  }
}

</mosaic_0001>

<bundles_post_ra>
// kernel: tpu_custom_call.1
= control target key start
LH: loop header
LB: loop body
LE: loop exit
PB: predicated region body
PF: predicated region fallthrough
CT: control target
= control target key end

     0   :  { %10 = vsyncpa [#allocation5], 0  ;;  %s2148_s0 = inlined_call_operand.hbm [shape: f32[2,4,256], index: 0, kind: input, shape index: {}]   ;;  %s2149_s1 = inlined_call_operand.vmem [shape: f32[4,100], index: 1, kind: input, shape index: {}]   ;;  %s2150_s2 = inlined_call_operand.vmem [shape: f32[4,1], index: 2, kind: input, shape index: {}]   ;;  %s2151_s3 = inlined_call_operand.vmem [shape: f32[4,36], index: 3, kind: input, shape index: {}]   ;;  %s2152_s4 = inlined_call_operand.vmem [shape: f32[4,1], index: 4, kind: input, shape index: {}]   ;;  %s2153_s5 = inlined_call_operand.hbm [shape: f32[2,4,256], index: 5, kind: output, shape index: {}]  }
   0x1   :  { %12 = vsyncpa [#allocation5 + $0x1], 0 }
   0x2   :  { %13 = vsyncpa [#allocation6], 0 }
   0x3   :  { %15 = vsyncpa [#allocation6 + $0x1], 0  ;;  %s1581_s18 = smov 0   ;;  %s1583_s19 = smov 0  }
   0x4   :  { %s1585_s20 = smov 0   ;;  %s1587_s21 = smov 0  }
   0x5 LB: > { %s1602_s22 = sadd.s32 4294967295, %s1519_s21   ;;  %s1136_s23 = sadd.s32 4294967294, %s1519_s21   ;;  %s1519_s21 = sphi %s1587_s21, %s2235_s21   ;;  %s1515_s20 = sphi %s1585_s20, %s2234_s20   ;;  %s1511_s19 = sphi %s1583_s19, %s2233_s19   ;;  %s1507_s18 = sphi %s1581_s18, %s2232_s18  }
   0x6   : > { %s1606_s24 = sadd.s32 1, %s1519_s21   ;;  %s28_s25 = sadd.s32 1, %s1515_s20 }
   0x7   : > { %s25_s26 = ssub.s32 %s1519_s21, %s1606_s24  ;;  %p35_p0 = scmp.ne.s32.totalorder %s1515_s20, %s1511_s19 }
   0x8   : > { %p26_p1 = scmp.eq.s32.totalorder %s25_s26, 0  ;;  %p36_p2 = scmp.eq.s32.totalorder %s1519_s21, 0 }
   0x9   : > { %p41_p3 = scmp.ne.s32.totalorder %s1511_s19, %s1507_s18  ;;  %p42_p4 = scmp.eq.s32.totalorder %s1602_s22, 0 }
   0xa   : > { %s1618_s27 = scalar_select %p26_p1, %s1515_s20, %s28_s25  }
   0xb   : > { %p1620_p5 = por %p36_p2, %p35_p0  ;;  %p1624_p6 = por %p42_p4, %p41_p3 }
   0xc   : > { %p149_p7 = scmp.eq.s32.totalorder %s1602_s22, 1  ;;  %p155_p8 = scmp.eq.s32.totalorder %s1136_s23, 1 }
   0xd   : > { %p1202_p10 = scmp.lt.s32.totalorder %s1519_s21, 2  ;;  %s187_s7 = sand.u32 1, %s1515_s20  }
   0xe   : > { %p1631_p11 = por %p149_p7, %p35_p0  ;;  %p1635_p12 = por %p155_p8, %p41_p3 }
   0xf   : > { %s1156_s8 = sshll.u32 %s1519_s21, 7  ;;  %s1139_s9 = sshll.u32 %s187_s7, 3 }
  0x10   : > { %s2185_s30 = scalar_select %p1631_p11, 1, 0 }
  0x11   : > { %s2186_s6 = scalar_select %p1635_p12, 1, 0 }
  0x12   : > { %s1644_s12 = scalar_lea.hbm %s2148_s0, %s1156_s8  ;;  %s191_s13 = scalar_lea.vmem [#allocation4], %s1139_s9 }
  0x13   : > { %s199_s14 = sshll.u32 %s191_s13, 4  ;;  %p1648_p13 = pnand %p1202_p10, %p1620_p5  ;;  %s1652_s14 = int_to_ptr.vmem [resolvable:$true] %s199_s14 }
  0x14   : > { %s188_s16 = scalar_lea.sflag [#allocation5], %s187_s7  ;;  %s1423_s17 = scalar_lea.hbm %s1644_s12, 128 }
  0x15   : > { %p1424_p2 = scmp.ne.s32.totalorder %s1644_s12, %s1423_s17  ;;  %p1425_p3 = pneg %p1648_p13 }
  0x16   : > { %s1428_s26 = scalar_lea.hbm %s2148_s0, 256  ;;  %p1429_p5 = scmp.lt.u32.totalorder %s1644_s12, %s2148_s0 }
  0x17   : > { %p1426_p4 = pnand %p1425_p3, %p1424_p2  ;;  %p1430_p8 = scmp.lt.u32.totalorder %s1428_s26, %s1423_s17 }
  0x18   : > { %p1432_p9 = scmp.lt.u32.totalorder %s1423_s17, %s1644_s12 }
  0x19   : > { %p1427_p7 = pneg %p1426_p4  ;;  %p1431_p10 = por %p1430_p8, %p1429_p5 }
  0x1b   : > { %p1433_p0 = por %p1432_p9, %p1431_p10 }
  0x1d   : > { %p1434_p1 = pnand %p1433_p0, %p1427_p7 }
  0x1f   : > { %1437 = shalt.err (!%p1434_p1)
}
  0x20   : > { %s1438_s7 = scalar_lea.vmem %s1652_s14, 128  ;;  %s1521_s9 = smov [#allocation4]  }
  0x21   : > { %p1439_p2 = scmp.ne.s32.totalorder %s1652_s14, %s1438_s7  ;;  %s1443_s10 = sshll.u32 %s1521_s9, 4  ;;  %s1444_s10 = int_to_ptr.vmem [resolvable:$false] %s1443_s10 }
  0x22   : > { %s1445_s11 = scalar_lea.vmem %s1444_s10, 256  ;;  %p1446_p11 = scmp.lt.s32.totalorder %s1652_s14, %s1444_s10 }
  0x23   : > { %p1441_p4 = pnand %p1439_p2, %p1425_p3  ;;  %p1447_p5 = scmp.lt.s32.totalorder %s1445_s11, %s1438_s7 }
  0x25   : > { %p1442_p12 = pneg %p1441_p4  ;;  %p1448_p8 = por %p1447_p5, %p1446_p11 }
  0x27   : > { %p1449_p9 = pnand %p1448_p8, %p1442_p12 }
  0x29   : > { %1452 = shalt.err (!%p1449_p9)
}
  0x2a   : > { %1197 = dma.hbm_to_vmem [thread:$0]  (!%p1648_p13), %s1644_s12, 128, %s1652_s14, %s188_s16  }
  0x2b   : > { %p2188_p0 = scmp.lt.s32.totalorder %s1519_s21, 3  ;;  %p2189_p1 = scmp.ge.s32.totalorder %s1519_s21, 1 }
  0x2d   : > { %p205_p3 = pnand %p2189_p1, %p2188_p0 }
  0x2e   : > { %s1686_s13 = sand.u32 (!%p205_p3), 1, %s1511_s19  }
  0x2f   : > { %208 = sbr.rel (%p205_p3) target bundleno = 1139 (0x473), region = 40  ;;  %s2155_s17 = sshll.u32 (!%p205_p3), %s1686_s13, 3 }
  0x30   : > { %s211_s23 = scalar_lea.sflag (!%p205_p3), [#allocation5], %s1686_s13  ;;  %s214_s15 = scalar_lea.vmem (!%p205_p3), [#allocation4], %s2155_s17 }
  0x36   : > { %1498 = dma.done.wait (%p1624_p6), %s211_s23, 128  }
  0x37   : > { %1500 = vsyncadd (%p1624_p6), %s211_s23, 4294967168  ;;  %vm269_vm0 = vcmask 551936   ;;  %vm284_vm1 = vcmask 273408   ;;  %v1522_v0 = vmov 0.0   ;;  %v271_v1 = vld [vmem:[%s214_s15] sm:$0xff]  ;;  %s1523_s12 = smov 34   ;;  %v241_v24 = vlaneseq }
  0x38   : > { %268 = vst [vmem:[#allocation2] sm:$0xff] %v1522_v0  ;;  %270 = vst.msk [vmem:[#allocation2 + $0x8] sm:$0xf] %vm269_vm0, %v1522_v0  ;;  %812 = vmatprep.mubr.f32.mxu0 %v1522_v0  ;;  %1037 = vmatprep.mubr.f32.mxu1 %v1522_v0  ;;  %vm280_vm2 = vcmask 1043728   ;;  %vm2174_vm3 = vcmask 1047556   ;;  %vm276_vm4 = vcmask 277504  }
  0x39   : > { %819 = vst [vmem:[#allocation3] sm:$0xff] %v1522_v0  ;;  %820 = vst.msk [vmem:[#allocation3 + $0x8] sm:$0xf] %vm284_vm1, %v1522_v0  ;;  %273 = vrot.lane.b32.xlu0 %v271_v1, %s1523_s12  ;;  %s1524_s29 = smov 125   ;;  %s2167_s14 = smov 127   ;;  %v1547_v12 = vmov 0  }
  0x3a   : > { %vm282_vm5 = vmor %vm2174_vm3, %vm280_vm2  ;;  %s2169_s16 = smov 112   ;;  %s2165_s25 = smov 126   ;;  %1379 = vset.pattern.permute.xlu0 %v1547_v12  ;;  %v732_v13 = vld [vmem:[%s2150_s2] sm:$0xf]  ;;  %v242_v27 = vand.u32 127, %v241_v24  ;;  %vm349_vm8 = vcmask 1022976  }
  0x3b   : > { %s1528_s26 = smov 111   ;;  %s1529_s28 = smov 124   ;;  %vm2173_vm9 = vcmask 1039360   ;;  %vm2180_vm10 = vcmask 916480   ;;  %vm374_vm13 = vcmask 1014784   ;;  %vm2177_vm0 = vcmask 908288  }
  0x3c   : > { %s2171_s8 = smov 95   ;;  %s1531_s7 = smov 108   ;;  %v243_v30 = vadd.s32 128, %v242_v27  ;;  %v248_v33 = vand.u32 15, %v242_v27  ;;  %vm666_vm2 = vcmask 1043456   ;;  %vm426_vm3 = vcmask 883712  }
  0x3d   : > { %s2156_s9 = smov 96   ;;  %s1533_s10 = smov 109  }
  0x3e   : > { %s2158_s11 = smov 80   ;;  %s2159_s23 = smov 93   ;;  %v255_v34 = vand.u32 15, %v243_v30  ;;  %v1805_v37 = vadd.s32 4294967294, %v248_v33  ;;  %v1823_v45 = vadd.s32 4294967295, %v248_v33  ;;  %v1825_v46 = vadd.s32 1, %v248_v33 }
  0x3f   : > { %s2162_s15 = smov 92   ;;  %s2160_s12 = smov 94   ;;  %v1836_v51 = vadd.s32 2, %v248_v33 }
  0x40   : > { %s1538_s17 = smov 76   ;;  %v1807_v38 = vadd.s32 4294967294, %v255_v34  ;;  %vm290_vm6 = vcmp.ge.s32.totalorder %v1805_v37, 0  ;;  %v1815_v41 = vadd.s32 4294967295, %v255_v34  ;;  %v1817_v42 = vadd.s32 1, %v255_v34  ;;  %p2229_p11 = scmp.ne.s32.totalorder %s2185_s30, 0 }
  0x41   : > { %vm2182_vm14 = vcmp.ge.s32.totalorder %v1823_v45, 0  ;;  %vm2175_vm15 = vcmp.lt.s32.totalorder %v1825_v46, 16  ;;  %v1839_v56 = vadd.s32 2, %v255_v34 }
  0x42   : > { %vm291_vm7 = vcmp.ge.s32.totalorder %v1807_v38, 0  ;;  %vm308_vm11 = vcmp.ge.s32.totalorder %v1815_v41, 0  ;;  %vm336_vm12 = vcmp.lt.s32.totalorder %v1817_v42, 16 }
  0xab   : > { %v274_v2 = vpop.permute.xlu0 %273 }
  0xac   : > { %v275_v3 = vrot.slane %v274_v2, 4 }
  0xae   : > { %v277_v4 = vsel %vm276_vm4, %v275_v3, %v274_v2  ;;  %285 = vst.msk [vmem:[#allocation2 + $0x8] sm:$0xf] %vm284_vm1, %v275_v3  ;;  %vm2176_vm1 = vcmask 1031168   ;;  %vm2178_vm4 = vcmask 777216  }
  0xaf   : > { %283 = vst.msk [vmem:[#allocation2] sm:$0xff] %vm282_vm5, %v277_v4  ;;  %vm2179_vm5 = vcmask 900096  }
  0xb5   : > { %v287_v6 = vld [vmem:[#allocation2 + $0x8] sm:$0xf] }
  0xb6   : > { %v1699_v5 = vld [vmem:[#allocation2] sm:$0xff]  ;;  %v619_v7 = vcombine.low %v287_v6, %v287_v6 }
  0xb7   : > { %343 = vrot.lane.b32.xlu0 %v1699_v5, %s1524_s29  ;;  %318 = vrot.lane.b32.xlu1 %v1699_v5, %s2167_s14  ;;  %v1742_v9 = vcombine.high %v1699_v5, %v1699_v5  ;;  %v618_v11 = vcombine.low %v1699_v5, %v1699_v5  ;;  %v303_v48 = vsel %vm290_vm6, %v1699_v5, 0.0 }
  0xb8   : > { %v1264_v8 = vpack.i.bf16 %v619_v7, %v1699_v5 }
  0xb9   : > { %v1279_v10 = vpack.i.bf16 %v287_v6, %v1742_v9  ;;  %v304_v47 = vsel %vm291_vm7, %v1742_v9, 0.0 }
  0xbb   : > { %381 = vrot.lane.b32.xlu0 %v1699_v5, %s2169_s16  ;;  %595 = vrot.lane.b32.xlu1 %v1699_v5, %s2165_s25 }
  0xbf   : > { %394 = vrot.lane.b32.xlu0 %v1699_v5, %s1528_s26  ;;  %368 = vrot.lane.b32.xlu1 %v1699_v5, %s1529_s28 }
  0xc3   : > { %446 = vrot.lane.b32.xlu0 %v1699_v5, %s2171_s8  ;;  %420 = vrot.lane.b32.xlu1 %v1699_v5, %s1531_s7 }
  0xc7   : > { %433 = vrot.lane.b32.xlu0 %v1699_v5, %s2156_s9  ;;  %407 = vrot.lane.b32.xlu1 %v1699_v5, %s1533_s10  ;;  %s2163_s9 = smov 79  }
  0xcb   : > { %485 = vrot.lane.b32.xlu0 %v1699_v5, %s2158_s11  ;;  %459 = vrot.lane.b32.xlu1 %v1699_v5, %s2159_s23  ;;  %s2164_s11 = smov 77   ;;  %s1541_s23 = smov 63  }
  0xcf   : > { %472 = vrot.lane.b32.xlu0 %v1699_v5, %s2162_s15  ;;  %643 = vrot.lane.b32.xlu1 %v1699_v5, %s2160_s12  ;;  %s1542_s12 = smov 61   ;;  %s1543_s15 = smov 110  }
  0xd3   : > { %524 = vrot.lane.b32.xlu0 %v1699_v5, %s1538_s17  ;;  %498 = vrot.lane.b32.xlu1 %v1699_v5, %s2163_s9  ;;  %s1544_s9 = smov 64  }
  0xd7   : > { %511 = vrot.lane.b32.xlu0 %v1699_v5, %s2164_s11  ;;  %550 = vrot.lane.b32.xlu1 %v1699_v5, %s1541_s23  ;;  %s1545_s11 = smov 78  }
  0xdb   : > { %563 = vrot.lane.b32.xlu0 %v1699_v5, %s1542_s12  ;;  %1265 = vrot.lane.b32.xlu1 %v1264_v8, %s1543_s15 }
  0xdf   : > { %537 = vrot.lane.b32.xlu0 %v1699_v5, %s1544_s9  ;;  %1270 = vrot.lane.b32.xlu1 %v1264_v8, %s1545_s11 }
  0xe3   : > { %1280 = vrot.lane.b32.xlu1 %v1279_v10, %s1524_s29  ;;  %1275 = vrot.lane.b32.xlu0 %v1279_v10, %s2167_s14  ;;  %s2190_s29 = smov 93   ;;  %s2192_s14 = smov 92  }
  0xe7   : > { %1285 = vrot.lane.b32.xlu1 %v1279_v10, %s2165_s25  ;;  %1290 = vrot.lane.b32.xlu0 %v1279_v10, %s2169_s16  ;;  %s2191_s25 = smov 96   ;;  %s2194_s16 = smov 94  }
  0xeb   : > { %1295 = vrot.lane.b32.xlu1 %v1279_v10, %s1529_s28  ;;  %1300 = vrot.lane.b32.xlu0 %v1279_v10, %s1528_s26  ;;  %s2193_s28 = smov 80  }
  0xef   : > { %1310 = vrot.lane.b32.xlu1 %v1279_v10, %s2171_s8  ;;  %1305 = vrot.lane.b32.xlu0 %v1279_v10, %s1531_s7  ;;  %s2195_s7 = smov 79   ;;  %s2196_s8 = smov 77  }
  0xf3   : > { %1315 = vrot.lane.b32.xlu1 %v1279_v10, %s1533_s10  ;;  %620 = vrot.lane.b32.xlu0 %v618_v11, %s1543_s15  ;;  %s1546_s10 = smov 62  }
  0xf7   : > { %1325 = vrot.lane.b32.xlu1 %v1279_v10, %s2190_s29  ;;  %1320 = vrot.lane.b32.xlu0 %v1279_v10, %s2191_s25 }
  0xfb   : > { %1335 = vrot.lane.b32.xlu1 %v1279_v10, %s2192_s14  ;;  %1330 = vrot.lane.b32.xlu0 %v1279_v10, %s2193_s28  ;;  %s1548_s14 = smov 60   ;;  %s2206_s28 = smov 126  }
  0xff   : > { %1340 = vrot.lane.b32.xlu1 %v1279_v10, %s2194_s16  ;;  %1345 = vrot.lane.b32.xlu0 %v1279_v10, %s1538_s17 }
 0x103   : > { %1350 = vrot.lane.b32.xlu1 %v1279_v10, %s2195_s7  ;;  %1355 = vrot.lane.b32.xlu0 %v1279_v10, %s2196_s8  ;;  %s2207_s7 = smov 95  }
 0x107   : > { %1365 = vrot.lane.b32.xlu1 %v1279_v10, %s1542_s12  ;;  %1360 = vrot.lane.b32.xlu0 %v1279_v10, %s1541_s23  ;;  %s2204_s23 = smov 112   ;;  %s2205_s12 = smov 127  }
 0x10b   : > { %1370 = vrot.lane.b32.xlu1 %v1279_v10, %s1544_s9  ;;  %683 = vrot.lane.b32.xlu0 %v618_v11, %s1545_s11  ;;  %s1549_s11 = smov 17  }
 0x10f   : > { %1375 = vrot.lane.b32.xlu1 %v1279_v10, %s1546_s10  ;;  %706 = vrot.lane.b32.xlu0 %v1699_v5, %s1546_s10 }
 0x113   : > { %578 = vrot.lane.b32.xlu1 %v1742_v9, %s1548_s14  ;;  %580 = vrot.lane.b32.xlu0 %v287_v6, %s1548_s14 }
 0x117   : > { %576 = vrot.lane.b32.xlu1 %v1699_v5, %s1548_s14  ;;  %735 = vperm.xlu0 %1379, %v732_v13  }
 0x129   : > { %v344_v14 = vpop.permute.xlu0 %343  ;;  %v319_v15 = vpop.permute.xlu1 %318 }
 0x12d   : > { %v1773_v16 = vpop.permute.xlu0 %381  ;;  %v1775_v17 = vpop.permute.xlu1 %595 }
 0x131   : > { %v1777_v18 = vpop.permute.xlu0 %394  ;;  %v1779_v19 = vpop.permute.xlu1 %368 }
 0x135   : > { %v1781_v20 = vpop.permute.xlu0 %446  ;;  %v1783_v21 = vpop.permute.xlu1 %420 }
 0x139   : > { %v1785_v22 = vpop.permute.xlu0 %433  ;;  %v1787_v23 = vpop.permute.xlu1 %407 }
 0x13d   : > { %v1789_v25 = vpop.permute.xlu0 %485  ;;  %v1791_v26 = vpop.permute.xlu1 %459 }
 0x141   : > { %v1793_v28 = vpop.permute.xlu0 %472  ;;  %v1795_v29 = vpop.permute.xlu1 %643 }
 0x145   : > { %v1797_v31 = vpop.permute.xlu0 %524  ;;  %v1799_v32 = vpop.permute.xlu1 %498 }
 0x149   : > { %v1801_v35 = vpop.permute.xlu0 %511  ;;  %v1803_v36 = vpop.permute.xlu1 %550 }
 0x14d   : > { %v1809_v39 = vpop.permute.xlu0 %563  ;;  %v1811_v40 = vpop.permute.xlu1 %1265 }
 0x14e   : > { %v1268_v33 = vunpack.i.h.bf16 %v1811_v40  ;;  %v1267_v34 = vunpack.i.l.bf16 %v1811_v40 }
 0x151   : > { %v1819_v43 = vpop.permute.xlu0 %537  ;;  %v1821_v44 = vpop.permute.xlu1 %1270 }
 0x155   : > { %v1281_v49 = vpop.permute.xlu1 %1280  ;;  %v1276_v50 = vpop.permute.xlu0 %1275 }
 0x156   : > { %v1283_v52 = vunpack.i.h.bf16 %v1281_v49  ;;  %v1282_v53 = vunpack.i.l.bf16 %v1281_v49  ;;  %v1278_v54 = vunpack.i.h.bf16 %v1276_v50  ;;  %v1277_v55 = vunpack.i.l.bf16 %v1276_v50 }
 0x158   : > { %v350_v57 = vsel %vm349_vm8, %v344_v14, %v1282_v53  ;;  %v351_v58 = vsel %vm349_vm8, %v1282_v53, %v1283_v52  ;;  %v325_v59 = vsel %vm2173_vm9, %v319_v15, %v1277_v55  ;;  %v326_v60 = vsel %vm2173_vm9, %v1277_v55, %v1278_v54 }
 0x159   : > { %v1286_v61 = vpop.permute.xlu1 %1285  ;;  %v1291_v62 = vpop.permute.xlu0 %1290  ;;  %v330_v63 = vsel %vm308_vm11, %v326_v60, 0.0  ;;  %v355_v0 = vsel %vm336_vm12, %v351_v58, 0.0  ;;  %v329_v1 = vsel %vm2182_vm14, %v325_v59, 0.0  ;;  %v354_v2 = vsel %vm2175_vm15, %v350_v57, 0.0 }
 0x15a   : > { %v1288_v3 = vunpack.i.h.bf16 %v1286_v61  ;;  %v1287_v4 = vunpack.i.l.bf16 %v1286_v61  ;;  %v1293_v5 = vunpack.i.h.bf16 %v1291_v62  ;;  %v1292_v6 = vunpack.i.l.bf16 %v1291_v62 }
 0x15b   : > { %vm360_vm8 = vcmp.lt.s32.totalorder %v1836_v51, 16  ;;  %v592_v7 = vrot.slane %v330_v63, 4  ;;  %v609_v8 = vrot.slane %v355_v0, 4  ;;  %vm361_vm9 = vcmp.lt.s32.totalorder %v1839_v56, 16 }
 0x15c   : > { %v591_v9 = vrot.slane %v329_v1, 4  ;;  %v388_v10 = vsel %vm2180_vm10, %v1773_v16, %v1292_v6  ;;  %v603_v11 = vsel %vm2176_vm1, %v1287_v4, %v1288_v3  ;;  %v608_v12 = vrot.slane %v354_v2, 4 }
 0x15d   : > { %v389_v13 = vsel %vm2180_vm10, %v1292_v6, %v1293_v5  ;;  %v1296_v14 = vpop.permute.xlu1 %1295  ;;  %v1301_v15 = vpop.permute.xlu0 %1300  ;;  %v668_v24 = vsel %vm666_vm2, %v304_v47, %v592_v7  ;;  %v670_v27 = vsel %vm666_vm2, %v603_v11, %v609_v8  ;;  %v602_v30 = vsel %vm2176_vm1, %v1775_v17, %v1287_v4 }
 0x15e   : > { %v1298_v16 = vunpack.i.h.bf16 %v1296_v14  ;;  %v1297_v49 = vunpack.i.l.bf16 %v1296_v14  ;;  %vm413_vm15 = vcmask 891904   ;;  %v1303_v50 = vunpack.i.h.bf16 %v1301_v15 }
 0x15f   : > { %v1302_v52 = vunpack.i.l.bf16 %v1301_v15  ;;  %v1158_v53 = vpack.c.bf16 %v670_v27, %v668_v24  ;;  %v667_v54 = vsel %vm666_vm2, %v303_v48, %v591_v9  ;;  %v392_v47 = vsel %vm290_vm6, %v388_v10, 0.0 }
 0x160   : > { %v393_v55 = vsel %vm291_vm7, %v389_v13, 0.0  ;;  %v376_v17 = vsel %vm374_vm13, %v1297_v49, %v1298_v16  ;;  %v669_v57 = vsel %vm666_vm2, %v602_v30, %v608_v12  ;;  %v375_v40 = vsel %vm374_vm13, %v1779_v19, %v1297_v49 }
 0x161   : > { %v402_v58 = vsel %vm2177_vm0, %v1302_v52, %v1303_v50  ;;  %1159 = vmatprep.subr.bf16.mxu0 %v1158_v53  ;;  %v1311_v59 = vpop.permute.xlu1 %1310  ;;  %v1306_v60 = vpop.permute.xlu0 %1305  ;;  %v1160_v61 = vpack.c.bf16 %v669_v57, %v667_v54  ;;  %v380_v48 = vsel %vm361_vm9, %v376_v17, 0.0  ;;  %v615_v2 = vrot.slane %v393_v55, 4 }
 0x162   : > { %v1313_v62 = vunpack.i.h.bf16 %v1311_v59  ;;  %v1312_v63 = vunpack.i.l.bf16 %v1311_v59  ;;  %v1308_v0 = vunpack.i.h.bf16 %v1306_v60  ;;  %v1307_v1 = vunpack.i.l.bf16 %v1306_v60 }
 0x163   : > { %v401_v3 = vsel %vm2177_vm0, %v1777_v18, %v1302_v52  ;;  %1161 = vmatpush1.bf16.msra.mxu0 %v1160_v61  ;;  %vm465_vm1 = vcmask 760832   ;;  %vm2181_vm13 = vcmask 785408   ;;  %v406_v5 = vsel %vm308_vm11, %v402_v58, 0.0 }
 0x164   : > { %v453_v19 = vsel %vm2178_vm4, %v1781_v20, %v1312_v63  ;;  %v454_v4 = vsel %vm2178_vm4, %v1312_v63, %v1313_v62  ;;  %v628_v6 = vsel %vm2179_vm5, %v1267_v34, %v1268_v33  ;;  %v614_v7 = vrot.slane %v392_v47, 4 }
 0x165   : > { %v428_v8 = vsel %vm426_vm3, %v1307_v1, %v1308_v0  ;;  %v1316_v9 = vpop.permute.xlu1 %1315  ;;  %v621_v10 = vpop.permute.xlu0 %620  ;;  %v672_v18 = vsel %vm666_vm2, %v380_v48, %v615_v2  ;;  %v379_v11 = vsel %vm360_vm8, %v375_v40, 0.0  ;;  %vm478_vm0 = vcmask 752640  }
 0x166   : > { %v1891_v20 = vsel %vm2182_vm14, %v453_v19, 0.0  ;;  %v458_v12 = vsel %vm308_vm11, %v454_v4, 0.0  ;;  %v427_v13 = vsel %vm426_vm3, %v1783_v21, %v1307_v1  ;;  %v405_v14 = vsel %vm2182_vm14, %v401_v3, 0.0 }
 0x167   : > { %vm491_vm4 = vcmask 654336   ;;  %v1318_v15 = vunpack.i.h.bf16 %v1316_v9  ;;  %v1317_v24 = vunpack.i.l.bf16 %v1316_v9  ;;  %v627_v27 = vsel %vm2179_vm5, %v621_v10, %v1267_v34 }
 0x168   : > { %v674_v30 = vsel %vm666_vm2, %v406_v5, %v628_v6  ;;  %v432_v33 = vsel %vm361_vm9, %v428_v8, 0.0  ;;  %v673_v16 = vsel %vm666_vm2, %v405_v14, %v627_v27  ;;  %v671_v50 = vsel %vm666_vm2, %v379_v11, %v614_v7 }
 0x169   : > { %v1162_v49 = vpack.c.bf16 %v674_v30, %v672_v18  ;;  %v431_v21 = vsel %vm360_vm8, %v427_v13, 0.0  ;;  %v414_v52 = vsel %vm413_vm15, %v1787_v23, %v1317_v24  ;;  %v415_v53 = vsel %vm413_vm15, %v1317_v24, %v1318_v15  ;;  %v1326_v54 = vpop.permute.xlu1 %1325  ;;  %v1321_v34 = vpop.permute.xlu0 %1320 }
 0x16a   : > { %v1164_v47 = vpack.c.bf16 %v673_v16, %v671_v50  ;;  %vm649_vm3 = vcmask 769024   ;;  %v1328_v55 = vunpack.i.h.bf16 %v1326_v54  ;;  %v1327_v17 = vunpack.i.l.bf16 %v1326_v54 }
 0x16b   : > { %1163 = vmatprep.subr.bf16.mxu0 %v1162_v49  ;;  %v1323_v57 = vunpack.i.h.bf16 %v1321_v34  ;;  %v1322_v40 = vunpack.i.l.bf16 %v1321_v34  ;;  %vm530_vm5 = vcmask 621568   ;;  %v639_v58 = vrot.slane %v1891_v20, 4 }
 0x16c   : > { %v640_v59 = vrot.slane %v458_v12, 4  ;;  %v634_v60 = vrot.slane %v432_v33, 4  ;;  %1165 = vmatpush1.bf16.msra.mxu0 %v1164_v47  ;;  %v419_v23 = vsel %vm336_vm12, %v415_v53, 0.0  ;;  %v466_v61 = vsel %vm465_vm1, %v1791_v26, %v1327_v17 }
 0x16d   : > { %v467_v48 = vsel %vm465_vm1, %v1327_v17, %v1328_v55  ;;  %v440_v62 = vsel %vm2181_vm13, %v1785_v22, %v1322_v40  ;;  %v441_v63 = vsel %vm2181_vm13, %v1322_v40, %v1323_v57  ;;  %v633_v0 = vrot.slane %v431_v21, 4  ;;  %v1336_v2 = vpop.permute.xlu1 %1335  ;;  %v1331_v3 = vpop.permute.xlu0 %1330 }
 0x16e   : > { %v471_v1 = vsel %vm336_vm12, %v467_v48, 0.0  ;;  %v445_v19 = vsel %vm291_vm7, %v441_v63, 0.0  ;;  %vm2197_vm15 = vcmp.lt.s32.totalorder %v1825_v46, 16  ;;  %v1338_v5 = vunpack.i.h.bf16 %v1336_v2 }
 0x16f   : > { %v418_v4 = vsel %vm2197_vm15, %v414_v52, 0.0  ;;  %vm2198_vm10 = vmmov %vm2197_vm15  ;;  %v1337_v6 = vunpack.i.l.bf16 %v1336_v2  ;;  %v676_v22 = vsel %vm666_vm2, %v419_v23, %v634_v60  ;;  %vm504_vm1 = vcmask 646144  }
 0x170   : > { %v470_v26 = vsel %vm2198_vm10, %v466_v61, 0.0  ;;  %vm517_vm13 = vcmask 629760   ;;  %v1333_v7 = vunpack.i.h.bf16 %v1331_v3  ;;  %v1332_v8 = vunpack.i.l.bf16 %v1331_v3 }
 0x171   : > { %v678_v9 = vsel %vm666_vm2, %v445_v19, %v640_v59  ;;  %v444_v10 = vsel %vm290_vm6, %v440_v62, 0.0  ;;  %v657_v18 = vrot.slane %v471_v1, 4  ;;  %v479_v11 = vsel %vm478_vm0, %v1793_v28, %v1337_v6  ;;  %v1341_v15 = vpop.permute.xlu1 %1340  ;;  %v1346_v24 = vpop.permute.xlu0 %1345 }
 0x172   : > { %v480_v20 = vsel %vm478_vm0, %v1337_v6, %v1338_v5  ;;  %v1166_v12 = vpack.c.bf16 %v678_v9, %v676_v22  ;;  %vm689_vm10 = vcmask 637952   ;;  %v492_v13 = vsel %vm491_vm4, %v1789_v25, %v1332_v8 }
 0x173   : > { %v493_v14 = vsel %vm491_vm4, %v1332_v8, %v1333_v7  ;;  %v675_v27 = vsel %vm666_vm2, %v418_v4, %v633_v0  ;;  %v677_v30 = vsel %vm666_vm2, %v444_v10, %v639_v58  ;;  %vm569_vm15 = vcmask 498688  }
 0x174   : > { %vm556_vm14 = vcmask 515072   ;;  %v496_v28 = vsel %vm290_vm6, %v492_v13, 0.0  ;;  %v497_v33 = vsel %vm291_vm7, %v493_v14, 0.0  ;;  %v1343_v16 = vunpack.i.h.bf16 %v1341_v15  ;;  %1167 = vmatprep.subr.bf16.mxu0 %v1166_v12 }
 0x175   : > { %v1342_v49 = vunpack.i.l.bf16 %v1341_v15  ;;  %v663_v25 = vrot.slane %v497_v33, 4  ;;  %v1348_v50 = vunpack.i.h.bf16 %v1346_v24  ;;  %v1347_v21 = vunpack.i.l.bf16 %v1346_v24  ;;  %v1351_v57 = vpop.permute.xlu1 %1350  ;;  %v1356_v40 = vpop.permute.xlu0 %1355 }
 0x176   : > { %v484_v52 = vsel %vm361_vm9, %v480_v20, 0.0  ;;  %v662_v53 = vrot.slane %v496_v28, 4  ;;  %v1168_v47 = vpack.c.bf16 %v677_v30, %v675_v27  ;;  %v1273_v60 = vunpack.i.h.bf16 %v1821_v44 }
 0x177   : > { %v650_v54 = vsel %vm649_vm3, %v1795_v29, %v1342_v49  ;;  %v651_v34 = vsel %vm649_vm3, %v1342_v49, %v1343_v16  ;;  %v531_v55 = vsel %vm530_vm5, %v1797_v31, %v1347_v21  ;;  %v532_v17 = vsel %vm530_vm5, %v1347_v21, %v1348_v50 }
 0x178   : > { %v680_v58 = vsel %vm666_vm2, %v651_v34, %v657_v18  ;;  %v682_v59 = vsel %vm666_vm2, %v484_v52, %v663_v25  ;;  %v656_v23 = vrot.slane %v470_v26, 4  ;;  %1169 = vmatpush1.bf16.msra.mxu0 %v1168_v47  ;;  %v1353_v61 = vunpack.i.h.bf16 %v1351_v57 }
 0x179   : > { %v1352_v29 = vunpack.i.l.bf16 %v1351_v57  ;;  %vm543_vm0 = vcmask 523264   ;;  %v1272_v48 = vunpack.i.l.bf16 %v1821_v44  ;;  %v1358_v62 = vunpack.i.h.bf16 %v1356_v40  ;;  %v1366_v26 = vpop.permute.xlu1 %1365  ;;  %v1361_v5 = vpop.permute.xlu0 %1360 }
 0x17a   : > { %v1357_v63 = vunpack.i.l.bf16 %v1356_v40  ;;  %v483_v31 = vsel %vm360_vm8, %v479_v11, 0.0  ;;  %v535_v0 = vsel %vm360_vm8, %v531_v55, 0.0  ;;  %v536_v1 = vsel %vm361_vm9, %v532_v17, 0.0 }
 0x17b   : > { %v1170_v2 = vpack.c.bf16 %v682_v59, %v680_v58  ;;  %v679_v3 = vsel %vm666_vm2, %v650_v54, %v656_v23  ;;  %v506_v19 = vsel %vm504_vm1, %v1352_v29, %v1353_v61  ;;  %v681_v6 = vsel %vm666_vm2, %v483_v31, %v662_v53 }
 0x17c   : > { %v518_v4 = vsel %vm517_vm13, %v1801_v35, %v1357_v63  ;;  %v519_v44 = vsel %vm517_vm13, %v1357_v63, %v1358_v62  ;;  %vm712_vm4 = vcmask 506880   ;;  %v1368_v22 = vunpack.i.h.bf16 %v1366_v26 }
 0x17d   : > { %1171 = vmatprep.subr.bf16.mxu0 %v1170_v2  ;;  %v1367_v7 = vunpack.i.l.bf16 %v1366_v26  ;;  %v1363_v8 = vunpack.i.h.bf16 %v1361_v5  ;;  %v1362_v9 = vunpack.i.l.bf16 %v1361_v5  ;;  %v696_v10 = vrot.slane %v535_v0, 4  ;;  %v684_v27 = vpop.permute.xlu0 %683 }
 0x17e   : > { %v505_v18 = vsel %vm504_vm1, %v1799_v32, %v1352_v29  ;;  %v1172_v11 = vpack.c.bf16 %v681_v6, %v679_v3  ;;  %v691_v20 = vsel %vm689_vm10, %v1272_v48, %v1273_v60  ;;  %vm582_vm5 = vcmask 490496   ;;  %v1371_v32 = vpop.permute.xlu1 %1370 }
 0x17f   : > { %v570_v35 = vsel %vm569_vm15, %v1809_v39, %v1367_v7  ;;  %v571_v12 = vsel %vm569_vm15, %v1367_v7, %v1368_v22  ;;  %v557_v13 = vsel %vm556_vm14, %v1803_v36, %v1362_v9  ;;  %v510_v14 = vsel %vm308_vm11, %v506_v19, 0.0  ;;  %v731_v7 = vld [vmem:[%s2149_s1] sm:$0xf] }
 0x180   : > { %v697_v15 = vrot.slane %v536_v1, 4  ;;  %v558_v24 = vsel %vm556_vm14, %v1362_v9, %v1363_v8  ;;  %1173 = vmatpush1.bf16.msra.mxu0 %v1172_v11  ;;  %v523_v30 = vsel %vm336_vm12, %v519_v44, 0.0  ;;  %vm2199_vm13 = vcmp.lt.s32.totalorder %v1825_v46, 16 }
 0x181   : > { %v522_v39 = vsel %vm2199_vm13, %v518_v4, 0.0  ;;  %vm2200_vm1 = vmmov %vm2199_vm13  ;;  %v575_v36 = vsel %vm336_vm12, %v571_v12, 0.0  ;;  %vm2201_vm15 = vcmp.ge.s32.totalorder %v1823_v45, 0  ;;  %v1373_v49 = vunpack.i.h.bf16 %v1371_v32  ;;  %v707_v40 = vpop.permute.xlu0 %706 }
 0x182   : > { %v574_v28 = vsel %vm2200_vm1, %v570_v35, 0.0  ;;  %v561_v33 = vsel %vm2201_vm15, %v557_v13, 0.0  ;;  %vm2202_vm14 = vmmov %vm2201_vm15  ;;  %v1372_v25 = vunpack.i.l.bf16 %v1371_v32  ;;  %v690_v50 = vsel %vm689_vm10, %v684_v27, %v1272_v48  ;;  %v1376_v57 = vpop.permute.xlu1 %1375 }
 0x183   : > { %v509_v16 = vsel %vm2202_vm14, %v505_v18, 0.0  ;;  %v724_v21 = vsel %vm666_vm2, %v510_v14, %v691_v20  ;;  %v562_v52 = vsel %vm308_vm11, %v558_v24, 0.0  ;;  %v726_v54 = vsel %vm666_vm2, %v523_v30, %v697_v15  ;;  %v957_v30 = vld [vmem:[%s2152_s4] sm:$0xf]  ;;  %vm2210_vm13 = vmmov %vm2202_vm14 }
 0x184   : > { %v723_v53 = vsel %vm666_vm2, %v509_v16, %v690_v50  ;;  %v725_v34 = vsel %vm666_vm2, %v522_v39, %v696_v10  ;;  %v544_v47 = vsel %vm543_vm0, %v1819_v43, %v1372_v25  ;;  %v545_v55 = vsel %vm543_vm0, %v1372_v25, %v1373_v49 }
 0x185   : > { %v1174_v17 = vpack.c.bf16 %v726_v54, %v724_v21  ;;  %v1176_v58 = vpack.c.bf16 %v725_v34, %v723_v53  ;;  %v1378_v59 = vunpack.i.h.bf16 %v1376_v57  ;;  %v1377_v60 = vunpack.i.l.bf16 %v1376_v57  ;;  %v581_v2 = vpop.permute.xlu0 %580 }
 0x186   : > { %v549_v23 = vsel %vm291_vm7, %v545_v55, 0.0  ;;  %v548_v61 = vsel %vm290_vm6, %v544_v47, 0.0  ;;  %v719_v29 = vrot.slane %v574_v28, 4  ;;  %v720_v48 = vrot.slane %v575_v36, 4  ;;  %v579_v1 = vpop.permute.xlu1 %578 }
 0x187   : > { %v702_v62 = vrot.slane %v561_v33, 4  ;;  %v703_v63 = vrot.slane %v562_v52, 4  ;;  %1175 = vmatprep.subr.bf16.mxu0 %v1174_v17  ;;  %v714_v43 = vsel %vm712_vm4, %v1377_v60, %v1378_v59  ;;  %v713_v31 = vsel %vm712_vm4, %v707_v40, %v1377_v60 }
 0x188   : > { %1177 = vmatpush1.bf16.msra.mxu0 %v1176_v58  ;;  %v729_v0 = vsel %vm666_vm2, %v713_v31, %v719_v29  ;;  %v730_v3 = vsel %vm666_vm2, %v714_v43, %v720_v48  ;;  %v584_v19 = vsel %vm582_vm5, %v579_v1, %v581_v2  ;;  %vm738_vm6 = vcmask 818176  }
 0x189   : > { %v728_v38 = vsel %vm666_vm2, %v549_v23, %v703_v63  ;;  %v727_v37 = vsel %vm666_vm2, %v548_v61, %v702_v62  ;;  %v588_v26 = vsel %vm361_vm9, %v584_v19, 0.0  ;;  %vm831_vm7 = vcmask 1043592  }
 0x18a   : > { %v1178_v4 = vpack.c.bf16 %v730_v3, %v728_v38  ;;  %v1180_v44 = vpack.c.bf16 %v729_v0, %v727_v37  ;;  %v577_v5 = vpop.permute.xlu1 %576  ;;  %vm827_vm9 = vcmask 138240   ;;  %vm834_vm10 = vcmask 134144  }
 0x18b   : > { %v583_v6 = vsel %vm582_vm5, %v577_v5, %v579_v1  ;;  %vm2208_vm4 = vcmask 916480   ;;  %vm2211_vm1 = vcmask 1039360   ;;  %vm2212_vm15 = vcmask 1031168  }
 0x18c   : > { %1179 = vmatprep.subr.bf16.mxu0 %v1178_v4  ;;  %v587_v22 = vsel %vm360_vm8, %v583_v6, 0.0  ;;  %vm2203_vm8 = vcmask 1047556   ;;  %vm2209_vm5 = vmmov %vm2208_vm4 }
 0x18d   : > { %1181 = vmatpush1.bf16.msra.mxu0 %v1180_v44  ;;  %vm832_vm0 = vmor %vm2203_vm8, %vm831_vm7 }
 0x18e   : > { %1145 = vmatprep.subr.msk.mxu0 %vm666_vm2, %v588_v26  ;;  %vm2213_vm14 = vmmov %vm2212_vm15 }
 0x18f   : > { %vm2215_vm7 = vmmov %vm2211_vm1 }
 0x191   : > { %1146 = vmatpush1.msk.msra.mxu0 %vm666_vm2, %v587_v22 }
 0x192   : > { %1147 = vmatmul.mubr.msk.f32.vlgmr.msra.gmra.mrb[0].mxu0 %vm738_vm6, %v731_v7  ;;  %vm2214_vm6 = vcmp.lt.s32.totalorder %v1825_v46, 16 }
 0x196   : > { %v736_v8 = vpop.permute.xlu0 %735 }
 0x265   : > { %v814_v56 = vpop.f32.mrb[0].mxu0 }
 0x266   : > { %v815_v9 = vadd.f32 %v814_v56, %v736_v8  ;;  %v816_v10 = vpop.f32.mrb[1].mxu0 }
 0x267   : > { %v817_v18 = vadd.f32 %v816_v10, %v736_v8 }
 0x269   : > { %v823_v11 = vcombine.low %v815_v9, %v817_v18 }
 0x26b   : > { %824 = vrot.lane.b32.xlu1 %v823_v11, %s1549_s11 }
 0x2dd   : > { %v825_v51 = vpop.permute.xlu1 %824 }
 0x2de   : > { %v826_v20 = vrot.slane %v825_v51, 4 }
 0x2e0   : > { %v828_v35 = vsel %vm827_vm9, %v826_v20, %v825_v51  ;;  %835 = vst.msk [vmem:[#allocation3 + $0x8] sm:$0xf] %vm834_vm10, %v826_v20  ;;  %vm2216_vm9 = vmmov %vm2210_vm13  ;;  %vm2217_vm10 = vcmask 900096  }
 0x2e1   : > { %833 = vst.msk [vmem:[#allocation3] sm:$0xff] %vm832_vm0, %v828_v35  ;;  %vm2218_vm8 = vmmov %vm2217_vm10  ;;  %vm2219_vm0 = vcmask 785408  }
 0x2e7   : > { %v837_v12 = vld [vmem:[#allocation3 + $0x8] sm:$0xf] }
 0x2e8   : > { %v836_v13 = vld [vmem:[#allocation3] sm:$0xff]  ;;  %v905_v14 = vcombine.low %v837_v12, %v837_v12 }
 0x2e9   : > { %922 = vrot.lane.b32.xlu1 %v836_v13, %s1528_s26  ;;  %856 = vrot.lane.b32.xlu0 %v836_v13, %s2204_s23  ;;  %v839_v24 = vcombine.high %v836_v13, %v836_v13  ;;  %v904_v27 = vcombine.low %v836_v13, %v836_v13  ;;  %v841_v2 = vsel %vm2216_vm9, %v836_v13, 0.0 }
 0x2ea   : > { %v1380_v15 = vpack.i.bf16 %v905_v14, %v836_v13 }
 0x2eb   : > { %v1390_v32 = vpack.i.bf16 %v837_v12, %v839_v24  ;;  %v842_v48 = vsel %vm308_vm11, %v839_v24, 0.0 }
 0x2ed   : > { %1381 = vrot.lane.b32.xlu1 %v1380_v15, %s2205_s12  ;;  %844 = vrot.lane.b32.xlu0 %v836_v13, %s2206_s28 }
 0x2f1   : > { %868 = vrot.lane.b32.xlu0 %v836_v13, %s1543_s15  ;;  %1391 = vrot.lane.b32.xlu1 %v1390_v32, %s2204_s23  ;;  %s1052_s23 = scalar_lea.sflag [#allocation6], %s1686_s13 }
 0x2f5   : > { %880 = vrot.lane.b32.xlu0 %v836_v13, %s2191_s25  ;;  %1396 = vrot.lane.b32.xlu1 %v1390_v32, %s2206_s28 }
 0x2f9   : > { %1386 = vrot.lane.b32.xlu0 %v1380_v15, %s2207_s7  ;;  %906 = vrot.lane.b32.xlu1 %v904_v27, %s2205_s12 }
 0x2fd   : > { %1401 = vrot.lane.b32.xlu0 %v1390_v32, %s1543_s15  ;;  %1406 = vrot.lane.b32.xlu1 %v1390_v32, %s2191_s25  ;;  %s2228_s15 = sshll.u32 %s1686_s13, 3 }
 0x2fe   : > { %s240_s17 = scalar_lea.vmem [#allocation7], %s2228_s15 }
 0x2ff   : > { %s1066_s29 = sshll.u32 %s240_s17, 4  ;;  %s2106_s29 = int_to_ptr.vmem [resolvable:$true] %s1066_s29 }
 0x300   : > { %s1453_s12 = scalar_lea.vmem %s2106_s29, 128 }
 0x301   : > { %938 = vrot.lane.b32.xlu0 %v904_v27, %s2207_s7  ;;  %1411 = vrot.lane.b32.xlu1 %v1390_v32, %s1528_s26  ;;  %s1157_s26 = sshll.u32 %s1602_s22, 7  ;;  %p1454_p6 = scmp.ne.s32.totalorder %s2106_s29, %s1453_s12 }
 0x302   : > { %s2104_s11 = scalar_lea.hbm %s2153_s5, %s1157_s26  ;;  %s1550_s22 = smov [#allocation7]  }
 0x303   : > { %p1455_p12 = pnand %p1454_p6, %p2229_p11  ;;  %s1457_s28 = sshll.u32 %s1550_s22, 4  ;;  %s1458_s28 = int_to_ptr.vmem [resolvable:$false] %s1457_s28 }
 0x304   : > { %s1459_s7 = scalar_lea.vmem %s1458_s28, 256  ;;  %p1460_p7 = scmp.lt.s32.totalorder %s2106_s29, %s1458_s28 }
 0x305   : > { %896 = vrot.lane.b32.xlu0 %v837_v12, %s2194_s16  ;;  %894 = vrot.lane.b32.xlu1 %v839_v24, %s2194_s16  ;;  %p1456_p13 = pneg %p1455_p12  ;;  %p1461_p10 = scmp.lt.s32.totalorder %s1459_s7, %s1453_s12 }
 0x307   : > { %p1462_p2 = por %p1461_p10, %p1460_p7 }
 0x309   : > { %960 = vperm.xlu0 %1379, %v957_v30   ;;  %892 = vrot.lane.b32.xlu1 %v836_v13, %s2194_s16  ;;  %p1463_p4 = pnand %p1462_p2, %p1456_p13 }
 0x35b   : > { %v2042_v39 = vpop.permute.xlu1 %922  ;;  %v857_v28 = vpop.permute.xlu0 %856 }
 0x35f   : > { %v1382_v36 = vpop.permute.xlu1 %1381  ;;  %v845_v33 = vpop.permute.xlu0 %844 }
 0x360   : > { %v1384_v21 = vunpack.i.h.bf16 %v1382_v36  ;;  %v1383_v52 = vunpack.i.l.bf16 %v1382_v36 }
 0x362   : > { %v913_v58 = vsel %vm2211_vm1, %v1383_v52, %v1384_v21  ;;  %vm2223_vm1 = vcmask 777216  }
 0x363   : > { %v869_v16 = vpop.permute.xlu0 %868  ;;  %v1392_v49 = vpop.permute.xlu1 %1391  ;;  %v949_v0 = vsel %vm666_vm2, %v842_v48, %v913_v58 }
 0x364   : > { %v1394_v25 = vunpack.i.h.bf16 %v1392_v49  ;;  %v1393_v50 = vunpack.i.l.bf16 %v1392_v49 }
 0x366   : > { %v862_v53 = vsel %vm2208_vm4, %v857_v28, %v1393_v50  ;;  %v863_v54 = vsel %vm2209_vm5, %v1393_v50, %v1394_v25  ;;  %vm2220_vm4 = vmmov %vm2219_vm0 }
 0x367   : > { %v881_v34 = vpop.permute.xlu0 %880  ;;  %v1397_v47 = vpop.permute.xlu1 %1396  ;;  %v867_v55 = vsel %vm308_vm11, %v863_v54, 0.0  ;;  %v866_v40 = vsel %vm2210_vm13, %v862_v53, 0.0  ;;  %vm2221_vm5 = vmmov %vm2214_vm6 }
 0x368   : > { %v1399_v17 = vunpack.i.h.bf16 %v1397_v47  ;;  %v1398_v57 = vunpack.i.l.bf16 %v1397_v47  ;;  %v919_v60 = vrot.slane %v867_v55, 4  ;;  %v918_v43 = vrot.slane %v866_v40, 4  ;;  %vm2222_vm13 = vmmov %vm2216_vm9  ;;  %v956_v47 = vld [vmem:[%s2151_s3] sm:$0xf] }
 0x36a   : > { %v851_v59 = vsel %vm2212_vm15, %v1398_v57, %v1399_v17  ;;  %v850_v23 = vsel %vm2213_vm14, %v845_v33, %v1398_v57  ;;  %vm2224_vm15 = vmmov %vm2223_vm1  ;;  %vm2225_vm14 = vcmask 908288  }
 0x36b   : > { %v1387_v61 = vpop.permute.xlu0 %1386  ;;  %v907_v29 = vpop.permute.xlu1 %906  ;;  %v855_v62 = vsel %vm336_vm12, %v851_v59, 0.0  ;;  %v854_v63 = vsel %vm2214_vm6, %v850_v23, 0.0  ;;  %vm2226_vm6 = vmmov %vm2225_vm14 }
 0x36c   : > { %v912_v31 = vsel %vm2215_vm7, %v907_v29, %v1383_v52  ;;  %v951_v1 = vsel %vm666_vm2, %v855_v62, %v919_v60  ;;  %v950_v37 = vsel %vm666_vm2, %v854_v63, %v918_v43  ;;  %v1389_v10 = vunpack.i.h.bf16 %v1387_v61 }
 0x36d   : > { %v1182_v38 = vpack.c.bf16 %v951_v1, %v949_v0  ;;  %v948_v3 = vsel %vm666_vm2, %v841_v2, %v912_v31  ;;  %v1388_v18 = vunpack.i.l.bf16 %v1387_v61  ;;  %vm963_vm7 = vcmask 293888  }
 0x36e   : > { %v1184_v19 = vpack.c.bf16 %v950_v37, %v948_v3 }
 0x36f   : > { %v1402_v4 = vpop.permute.xlu0 %1401  ;;  %v1407_v44 = vpop.permute.xlu1 %1406  ;;  %1183 = vmatprep.subr.bf16.mxu1 %v1182_v38  ;;  %v945_v30 = vsel %vm2224_vm15, %v1388_v18, %v1389_v10 }
 0x370   : > { %v1404_v26 = vunpack.i.h.bf16 %v1402_v4  ;;  %v1403_v5 = vunpack.i.l.bf16 %v1402_v4  ;;  %v1409_v6 = vunpack.i.h.bf16 %v1407_v44  ;;  %v1408_v22 = vunpack.i.l.bf16 %v1407_v44  ;;  %1185 = vmatpush1.bf16.msra.mxu1 %v1184_v19 }
 0x372   : > { %v874_v7 = vsel %vm2217_vm10, %v869_v16, %v1403_v5  ;;  %v875_v8 = vsel %vm2218_vm8, %v1403_v5, %v1404_v26  ;;  %v886_v56 = vsel %vm2219_vm0, %v881_v34, %v1408_v22  ;;  %v887_v9 = vsel %vm2220_vm4, %v1408_v22, %v1409_v6 }
 0x373   : > { %v878_v11 = vsel %vm2221_vm5, %v874_v7, 0.0  ;;  %v879_v51 = vsel %vm336_vm12, %v875_v8, 0.0  ;;  %v939_v20 = vpop.permute.xlu0 %938  ;;  %v1412_v35 = vpop.permute.xlu1 %1411  ;;  %v890_v15 = vsel %vm2222_vm13, %v886_v56, 0.0  ;;  %v891_v27 = vsel %vm308_vm11, %v887_v9, 0.0  ;;  %vm2227_vm11 = vmmov %vm2221_vm5 }
 0x374   : > { %v934_v12 = vrot.slane %v878_v11, 4  ;;  %v935_v13 = vrot.slane %v879_v51, 4  ;;  %v1414_v14 = vunpack.i.h.bf16 %v1412_v35  ;;  %v944_v24 = vsel %vm2223_vm1, %v939_v20, %v1388_v18 }
 0x375   : > { %v1413_v32 = vunpack.i.l.bf16 %v1412_v35  ;;  %v954_v49 = vsel %vm666_vm2, %v890_v15, %v944_v24  ;;  %v955_v25 = vsel %vm666_vm2, %v891_v27, %v945_v30 }
 0x377   : > { %v928_v28 = vsel %vm2225_vm14, %v2042_v39, %v1413_v32  ;;  %v929_v36 = vsel %vm2226_vm6, %v1413_v32, %v1414_v14  ;;  %v897_v33 = vpop.permute.xlu0 %896  ;;  %v895_v16 = vpop.permute.xlu1 %894 }
 0x378   : > { %v953_v45 = vsel %vm666_vm2, %v929_v36, %v935_v13  ;;  %v952_v50 = vsel %vm666_vm2, %v928_v28, %v934_v12  ;;  %v899_v41 = vsel %vm649_vm3, %v895_v16, %v897_v33 }
 0x379   : > { %v1186_v21 = vpack.c.bf16 %v955_v25, %v953_v45  ;;  %v1188_v52 = vpack.c.bf16 %v954_v49, %v952_v50  ;;  %v903_v39 = vsel %vm336_vm12, %v899_v41, 0.0 }
 0x37b   : > { %1187 = vmatprep.subr.bf16.mxu1 %v1186_v21  ;;  %v893_v53 = vpop.permute.xlu1 %892 }
 0x37c   : > { %v898_v54 = vsel %vm649_vm3, %v893_v53, %v895_v16  ;;  %1189 = vmatpush1.bf16.msra.mxu1 %v1188_v52 }
 0x37d   : > { %v902_v34 = vsel %vm2227_vm11, %v898_v54, 0.0  ;;  %1148 = vmatprep.subr.msk.mxu1 %vm666_vm2, %v903_v39 }
 0x380   : > { %1149 = vmatpush1.msk.msra.mxu1 %vm666_vm2, %v902_v34 }
 0x381   : > { %1150 = vmatmul.mubr.msk.f32.vlgmr.msra.gmra.mrb[0].mxu1 %vm963_vm7, %v956_v47 }
 0x388   : > { %v961_v42 = vpop.permute.xlu0 %960 }
 0x454   : > { %v1039_v55 = vpop.f32.mrb[0].mxu1 }
 0x455   : > { %v1040_v17 = vadd.f32 %v1039_v55, %v961_v42  ;;  %v1041_v57 = vpop.f32.mrb[1].mxu1 }
 0x456   : > { %v1042_v40 = vadd.f32 %v1041_v57, %v961_v42 }
 0x457   : > { %1419 = vtanh.f32 %v1040_v17 }
 0x458   : > { %1421 = vtanh.f32 %v1042_v40 }
 0x461   : > { %v1420_v46 = vpop.eup %1419 }
 0x462   : > { %v1422_v58 = vpop.eup %1421 }
 0x463   : > { %v1048_v59 = vcombine.low %v1420_v46, %v1422_v58 }
 0x465   : > { %1050 = vst [vmem:[%s240_s17] sm:$0xff] %v1048_v59 }
 0x466   : > { %1466 = shalt.err (!%p1463_p4)
}
 0x467   : > { %s1467_s13 = scalar_lea.hbm %s2104_s11, 128  ;;  %s1471_s16 = scalar_lea.hbm %s2153_s5, 256 }
 0x468   : > { %p1468_p5 = scmp.ne.s32.totalorder %s2104_s11, %s1467_s13  ;;  %p1472_p0 = scmp.lt.u32.totalorder %s2104_s11, %s2153_s5 }
 0x469   : > { %p1473_p1 = scmp.lt.u32.totalorder %s1471_s16, %s1467_s13  ;;  %p1475_p6 = scmp.lt.u32.totalorder %s1467_s13, %s2104_s11 }
 0x46a   : > { %p1469_p8 = pnand %p1468_p5, %p2229_p11 }
 0x46b   : > { %p1474_p3 = por %p1473_p1, %p1472_p0 }
 0x46c   : > { %p1470_p9 = pneg %p1469_p8 }
 0x46d   : > { %p1476_p12 = por %p1475_p6, %p1474_p3 }
 0x46f   : > { %p1477_p13 = pnand %p1476_p12, %p1470_p9 }
 0x471   : > { %1480 = shalt.err (!%p1477_p13)
}
 0x472   : > { %1192 = dma.vmem_to_hbm [thread:$0]  (%p2229_p11), %s2106_s29, 128, %s2104_s11, %s1052_s23  }
 0x473 PF: > { %s1078_s15 = sand.u32 1, %s1507_s18   ;;  %p2230_p7 = scmp.ne.s32.totalorder %s2186_s6, 0 }
 0x474   : > { %p2231_p10 = scmp.ge.s32.totalorder %s1519_s21, 2  ;;  %s1079_s17 = scalar_lea.sflag [#allocation6], %s1078_s15 }
 0x476   : > { %p1199_p2 = pnand %p2231_p10, %p2230_p7 }
 0x478   : > { %1502 = dma.done.wait (!%p1199_p2), %s1079_s17, 128  }
 0x479   : > { %1504 = vsyncadd (!%p1199_p2), %s1079_s17, 4294967168  ;;  %p18_p4 = scmp.ge.s32.totalorder %s1606_s24, 4   ;;  %s2232_s18 = smov %s1511_s19 }
 0x47a   : > { %s2233_s19 = smov %s1515_s20  ;;  %s2234_s20 = smov %s1618_s27 }
 0x47b   : > { %s2235_s21 = smov %s1606_s24  ;;  %20 = sbr.rel (!%p18_p4) target bundleno = 5 (0x5), region = 85 }
 0x482   :  { %1084 = vsyncpa [#allocation5], 1 }
 0x483   :  { %1086 = vsyncpa [#allocation5 + $0x1], 1 }
 0x484   :  { %1087 = vsyncpa [#allocation6], 1 }
 0x485   :  { %1089 = vsyncpa [#allocation6 + $0x1], 1 }

</bundles_post_ra>
